<compile_context>
chip_gen: v7x
topology: tpu7x:2x2x1
jax: 0.10.0
libtpu: 0.0.40
codegen_flags: <defaults>
</compile_context>

<pallas_src>
import functools

import jax
import jax.numpy as jnp
from jax import lax
from jax.experimental import pallas as pl
from jax.experimental.pallas import tpu as pltpu


def _round_half_even(x):
    # torch.round semantics (round-half-to-even) from floor/compare/select so
    # it lowers on every TPU generation without relying on a round primitive.
    f = jnp.floor(x)
    r = jnp.floor(x + 0.5)                              # round-half-up
    is_half = (x - f) == 0.5
    f_is_even = jnp.floor(f * 0.5) * 2.0 == f
    return jnp.where(jnp.logical_and(is_half, f_is_even), f, r)


def _shifted_rows(h, off, length):
    """shifted[l, :] = h[l + off, :] if 0 <= l + off < length else 0.

    Uses an XLU sublane rotate (free slot) + one mask; h stays in vregs
    (no padded-scratch store/reload).
    """
    if off == 0:
        return h
    rolled = pltpu.roll(h, shift=(-off) % length, axis=0)
    rows = lax.broadcasted_iota(jnp.int32, h.shape, 0)
    valid = jnp.logical_and(rows + off >= 0, rows + off < length)
    return jnp.where(valid, rolled, 0.0)


# ----------------------------------------------------------------------------
# Fused kernel: grid = (batch, mel_tile); duration predictor hoisted to the
# first mel step of each batch element, expansion done per (TM, L) slab.
# ----------------------------------------------------------------------------
def fused_length_regulator_kernel(
        x_ref, w1_ref, b1_ref, g1_ref, be1_ref,
        w2_ref, b2_ref, g2_ref, be2_ref, wl_ref, bl_ref,
        out_ref, dpo_ref, dur_ref,
        start_scr, cum_scr, *, alpha, pad, l_real, mel_max):
    L = x_ref.shape[1]            # padded phoneme length (multiple of 128)
    TM = out_ref.shape[1]         # mel tile
    mel_i = pl.program_id(1)

    # ---------------- duration predictor: once per batch element -----------
    @pl.when(mel_i == 0)
    def _predict():
        x_b = x_ref[0]                                           # (L, E) f32

        def conv_relu_ln(h, w_ref, b_ref, g_ref, be_ref):
            cin = h.shape[1]
            k = w_ref.shape[0] // cin
            # K shifted taps folded into one (L, K*Cin) @ (K*Cin, Cout) matmul
            # (bf16 operands, f32 accumulate on the MXU).
            taps = [_shifted_rows(h, t - pad, L) for t in range(k)]
            hcat = jnp.concatenate(taps, axis=1) if k > 1 else taps[0]
            acc = jnp.dot(hcat.astype(jnp.bfloat16),
                          w_ref[...].astype(jnp.bfloat16),
                          preferred_element_type=jnp.float32)
            h2 = jnp.maximum(acc + b_ref[...], 0.0)              # bias + ReLU
            mu = jnp.mean(h2, axis=-1, keepdims=True)
            var = jnp.mean((h2 - mu) ** 2, axis=-1, keepdims=True)
            ln = (h2 - mu) * lax.rsqrt(var + 1e-5) * g_ref[...] + be_ref[...]
            # zero the padded rows so the next conv's boundary tap sees true
            # zero padding (matches the unpadded torch reference exactly).
            rows = lax.broadcasted_iota(jnp.int32, ln.shape, 0)
            return jnp.where(rows < l_real, ln, 0.0)
            # TODO(synk): dropout is identity here (eval / p=0); training would
            # need pltpu.prng_* which this forward never exercises.

        h = conv_relu_ln(x_b, w1_ref, b1_ref, g1_ref, be1_ref)
        h = conv_relu_ln(h, w2_ref, b2_ref, g2_ref, be2_ref)

        # Linear head, lane-dense (1, L): (1,F) . (L,F)^T without explicit h.T
        pred = lax.dot_general(wl_ref[...], h, (((1,), (1,)), ((), ())),
                               preferred_element_type=jnp.float32) + bl_ref[...]
        lane = lax.broadcasted_iota(jnp.int32, (1, L), 1)
        dur_row = jnp.where(lane < l_real, jnp.exp(pred) * alpha, 0.0)  # (1,L)
        d_row = _round_half_even(dur_row)                               # (1,L)
        dur_ref[0] = dur_row
        dpo_ref[0] = d_row.astype(jnp.int32)

        # Inclusive prefix sum of the (1, L) row via log-step lane rolls (XLU);
        # exclusive start row is one more roll (avoids cum - d -> inf-inf NaN).
        cum = d_row
        sft = 1
        while sft < L:
            cum = cum + jnp.where(lane >= sft,
                                  pltpu.roll(cum, shift=sft, axis=1), 0.0)
            sft *= 2
        start = jnp.where(lane >= 1, pltpu.roll(cum, shift=1, axis=1), 0.0)
        # Clamp to mel_max before the int32 cast: frames past M are dropped
        # anyway, and this keeps the compares finite even if exp() overflowed.
        mel_f = float(mel_max)
        cum_scr[...] = jnp.minimum(cum, mel_f).astype(jnp.int32)
        start_scr[...] = jnp.minimum(start, mel_f).astype(jnp.int32)

    # -------------- length regulation for this (TM, L) mel slab ------------
    t_idx = lax.broadcasted_iota(jnp.int32, (TM, L), 0) + mel_i * TM    # int32
    align = jnp.logical_and(t_idx >= start_scr[...],
                            t_idx < cum_scr[...]).astype(jnp.float32)
    out_ref[0] = jnp.dot(align, x_ref[0],
                         preferred_element_type=jnp.float32,
                         precision=lax.Precision.HIGHEST   # exact row copies
                         ).astype(out_ref.dtype)


# ----------------------------------------------------------------------------
# Wrapper
# ----------------------------------------------------------------------------
def _const_spec(shape):
    nd = len(shape)
    return pl.BlockSpec(shape, lambda b, m, nd=nd: (0,) * nd)


def length_regulator_forward(x, params, *, alpha=1.0, mel_max_length=32,
                             conv_padding=1, mel_tile=None,
                             out_dtype=jnp.float32):
    B, L, E = x.shape
    K, Ein, Fd = params["w1"].shape
    assert Ein == E and params["wl"].shape == (1, Fd)
    assert K == 2 * conv_padding + 1, "same-length conv requires K == 2*pad+1"
    M = mel_max_length
    if mel_tile is None:
        mel_tile = 128 if M % 128 == 0 else M
    assert M % mel_tile == 0
    n_mel = M // mel_tile

    # Pad the phoneme axis to a multiple of 128: lane-dense dur/dpo stores and
    # full-width MXU contraction for align @ x; padded rows masked in-kernel.
    L_pad = max(128, ((L + 127) // 128) * 128)
    x_p = jnp.pad(x, ((0, 0), (0, L_pad - L), (0, 0))) if L_pad != L else x
    # TODO(synk): E / Fd are left unpadded (LayerNorm stats would need masked
    # sums); pad them to 128 for production channel sizes.

    # Fold the K conv taps into one contraction dim: (K, Cin, Cout)->(K*Cin, Cout)
    w1f = params["w1"].reshape(K * E, Fd)
    w2f = params["w2"].reshape(K * Fd, Fd)
    weights = (w1f, params["b1"], params["g1"], params["be1"],
               w2f, params["b2"], params["g2"], params["be2"],
               params["wl"], params["bl"])

    kern = functools.partial(fused_length_regulator_kernel, alpha=alpha,
                             pad=conv_padding, l_real=L, mel_max=M)

    out3, dpo3, dur3 = pl.pallas_call(
        kern,
        grid=(B, n_mel),
        out_shape=(
            jax.ShapeDtypeStruct((B, M, E), out_dtype),
            jax.ShapeDtypeStruct((B, 1, L_pad), jnp.int32),
            jax.ShapeDtypeStruct((B, 1, L_pad), jnp.float32),
        ),
        in_specs=[pl.BlockSpec((1, L_pad, E), lambda b, m: (b, 0, 0))]
                 + [_const_spec(w.shape) for w in weights],
        out_specs=(
            pl.BlockSpec((1, mel_tile, E), lambda b, m: (b, m, 0)),
            pl.BlockSpec((1, 1, L_pad), lambda b, m: (b, 0, 0)),
            pl.BlockSpec((1, 1, L_pad), lambda b, m: (b, 0, 0)),
        ),
        scratch_shapes=[
            pltpu.VMEM((1, L_pad), jnp.int32),   # start frame per phoneme
            pltpu.VMEM((1, L_pad), jnp.int32),   # end (cumsum) frame per phoneme
        ],
        compiler_params=pltpu.CompilerParams(
            dimension_semantics=("parallel", "arbitrary")),
        # TODO(synk): for B=1 on v7x, recompute start/cum per mel tile and mark
        # the mel axis "parallel" too so both TensorCores share the expansion.
    )(x_p, *weights)

    output = out3                        # (B, M, E)
    dpo = dpo3[:, 0, :L]                 # (B, L) int32
    durations = dur3[:, 0, :L]           # (B, L) float32
    return output, dpo, durations


# ----------------------------------------------------------------------------
# Deterministic parameter init + smoke test
# ----------------------------------------------------------------------------
def init_params(key, encoder_dim, filter_size, kernel_size):
    ks = jax.random.split(key, 3)
    s = 0.02  # small scale keeps exp(pred) ~ 1 so durations fit mel_max_length
    return {
        "w1": s * jax.random.normal(ks[0], (kernel_size, encoder_dim, filter_size), jnp.float32),
        "b1": jnp.zeros((1, filter_size), jnp.float32),
        "g1": jnp.ones((1, filter_size), jnp.float32),
        "be1": jnp.zeros((1, filter_size), jnp.float32),
        "w2": s * jax.random.normal(ks[1], (kernel_size, filter_size, filter_size), jnp.float32),
        "b2": jnp.zeros((1, filter_size), jnp.float32),
        "g2": jnp.ones((1, filter_size), jnp.float32),
        "be2": jnp.zeros((1, filter_size), jnp.float32),
        "wl": s * jax.random.normal(ks[2], (1, filter_size), jnp.float32),   # torch (out=1, in=F)
        "bl": jnp.zeros((1, 1), jnp.float32),
    }


if __name__ == "__main__":
    B, L = 2, 8                 # batch, phoneme sequence length
    ENC_DIM = 32                # encoder_dim
    FILTER = 32                 # duration_predictor_filter_size
    KERNEL = 3                  # duration_predictor_kernel_size (padding=1)
    MEL_MAX = 64                # static mel_max_length
    MEL_TILE = 32               # exercises the mel grid axis (2 tiles)

    key = jax.random.PRNGKey(0)
    kp, kx = jax.random.split(key)
    params = init_params(kp, ENC_DIM, FILTER, KERNEL)
    x = jax.random.normal(kx, (B, L, ENC_DIM), jnp.float32)

    output, dpo, durations = length_regulator_forward(
        x, params, alpha=1.0, mel_max_length=MEL_MAX, conv_padding=1,
        mel_tile=MEL_TILE)
    jax.block_until_ready((output, dpo, durations))

    assert output.shape == (B, MEL_MAX, ENC_DIM) and output.dtype == jnp.float32
    assert dpo.shape == (B, L) and dpo.dtype == jnp.int32
    assert durations.shape == (B, L) and durations.dtype == jnp.float32
    print("KERNEL_OK")
</pallas_src>

<mosaic_0001>
module attributes {stable_mosaic.version = 11 : i64} {
  func.func @fused_length_regulator_kernel(%arg0: i32, %arg1: i32, %arg2: memref<1x128x32xf32, #tpu.memory_space<vmem>>, %arg3: memref<96x32xf32, #tpu.memory_space<vmem>>, %arg4: memref<1x32xf32, #tpu.memory_space<vmem>>, %arg5: memref<1x32xf32, #tpu.memory_space<vmem>>, %arg6: memref<1x32xf32, #tpu.memory_space<vmem>>, %arg7: memref<96x32xf32, #tpu.memory_space<vmem>>, %arg8: memref<1x32xf32, #tpu.memory_space<vmem>>, %arg9: memref<1x32xf32, #tpu.memory_space<vmem>>, %arg10: memref<1x32xf32, #tpu.memory_space<vmem>>, %arg11: memref<1x32xf32, #tpu.memory_space<vmem>>, %arg12: memref<1x1xf32, #tpu.memory_space<vmem>>, %arg13: memref<1x32x32xf32, #tpu.memory_space<vmem>>, %arg14: memref<1x1x128xi32, #tpu.memory_space<vmem>>, %arg15: memref<1x1x128xf32, #tpu.memory_space<vmem>>, %arg16: memref<1x128xi32, #tpu.memory_space<vmem>>, %arg17: memref<1x128xi32, #tpu.memory_space<vmem>>) attributes {dimension_semantics = [#tpu.dimension_semantics<parallel>, #tpu.dimension_semantics<arbitrary>], iteration_bounds = array<i64: 2, 2>, scalar_prefetch = 0 : i64, scratch_operands = 2 : i64, tpu.core_type = #tpu.core_type<tc>, window_params = [{transform_indices = @transform_0, window_bounds = array<i64: 1, 128, 32>}, {pipeline_mode = #tpu.pipeline_mode<synchronous>, transform_indices = @transform_1, window_bounds = array<i64: 96, 32>}, {pipeline_mode = #tpu.pipeline_mode<synchronous>, transform_indices = @transform_2, window_bounds = array<i64: 1, 32>}, {pipeline_mode = #tpu.pipeline_mode<synchronous>, transform_indices = @transform_3, window_bounds = array<i64: 1, 32>}, {pipeline_mode = #tpu.pipeline_mode<synchronous>, transform_indices = @transform_4, window_bounds = array<i64: 1, 32>}, {pipeline_mode = #tpu.pipeline_mode<synchronous>, transform_indices = @transform_5, window_bounds = array<i64: 96, 32>}, {pipeline_mode = #tpu.pipeline_mode<synchronous>, transform_indices = @transform_6, window_bounds = array<i64: 1, 32>}, {pipeline_mode = #tpu.pipeline_mode<synchronous>, transform_indices = @transform_7, window_bounds = array<i64: 1, 32>}, {pipeline_mode = #tpu.pipeline_mode<synchronous>, transform_indices = @transform_8, window_bounds = array<i64: 1, 32>}, {pipeline_mode = #tpu.pipeline_mode<synchronous>, transform_indices = @transform_9, window_bounds = array<i64: 1, 32>}, {pipeline_mode = #tpu.pipeline_mode<synchronous>, transform_indices = @transform_10, window_bounds = array<i64: 1, 1>}, {transform_indices = @transform_11, window_bounds = array<i64: 1, 32, 32>}, {transform_indices = @transform_12, window_bounds = array<i64: 1, 1, 128>}, {transform_indices = @transform_13, window_bounds = array<i64: 1, 1, 128>}]} {
    %c0_i32 = arith.constant 0 : i32
    %0 = arith.cmpi eq, %arg1, %c0_i32 : i32
    %1 = arith.extui %0 : i1 to i32
    %c0_i32_0 = arith.constant 0 : i32
    %2 = arith.cmpi ne, %1, %c0_i32_0 : i32
    scf.if %2 {
      %c0_10 = arith.constant 0 : index
      %c0_11 = arith.constant 0 : index
      %c0_12 = arith.constant 0 : index
      %22 = vector.load %arg2[%c0_10, %c0_11, %c0_12] : memref<1x128x32xf32, #tpu.memory_space<vmem>>, vector<1x128x32xf32>
      %23 = vector.shape_cast %22 : vector<1x128x32xf32> to vector<128x32xf32>
      %c1_i32 = arith.constant 1 : i32
      %24 = tpu.dynamic_rotate %23 by %c1_i32 dim 0 : vector<128x32xf32>, i32 -> vector<128x32xf32>
      %25 = tpu.iota {dimensions = array<i32: 0>} : vector<128x32xi32>
      %c-1_i32 = arith.constant -1 : i32
      %26 = vector.broadcast %c-1_i32 : i32 to vector<128x32xi32>
      %27 = arith.addi %25, %26 : vector<128x32xi32>
      %c0_i32_13 = arith.constant 0 : i32
      %28 = vector.broadcast %c0_i32_13 : i32 to vector<128x32xi32>
      %29 = arith.cmpi sge, %27, %28 : vector<128x32xi32>
      %c-1_i32_14 = arith.constant -1 : i32
      %30 = vector.broadcast %c-1_i32_14 : i32 to vector<128x32xi32>
      %31 = arith.addi %25, %30 : vector<128x32xi32>
      %c128_i32 = arith.constant 128 : i32
      %32 = vector.broadcast %c128_i32 : i32 to vector<128x32xi32>
      %33 = arith.cmpi slt, %31, %32 : vector<128x32xi32>
      %34 = arith.andi %29, %33 : vector<128x32xi1>
      %cst_15 = arith.constant 0.000000e+00 : f32
      %35 = vector.broadcast %cst_15 : f32 to vector<128x32xf32>
      %36 = arith.select %34, %24, %35 : vector<128x32xi1>, vector<128x32xf32>
      %c127_i32 = arith.constant 127 : i32
      %37 = tpu.dynamic_rotate %23 by %c127_i32 dim 0 : vector<128x32xf32>, i32 -> vector<128x32xf32>
      %38 = tpu.iota {dimensions = array<i32: 0>} : vector<128x32xi32>
      %c1_i32_16 = arith.constant 1 : i32
      %39 = vector.broadcast %c1_i32_16 : i32 to vector<128x32xi32>
      %40 = arith.addi %38, %39 : vector<128x32xi32>
      %c0_i32_17 = arith.constant 0 : i32
      %41 = vector.broadcast %c0_i32_17 : i32 to vector<128x32xi32>
      %42 = arith.cmpi sge, %40, %41 : vector<128x32xi32>
      %c1_i32_18 = arith.constant 1 : i32
      %43 = vector.broadcast %c1_i32_18 : i32 to vector<128x32xi32>
      %44 = arith.addi %38, %43 : vector<128x32xi32>
      %c128_i32_19 = arith.constant 128 : i32
      %45 = vector.broadcast %c128_i32_19 : i32 to vector<128x32xi32>
      %46 = arith.cmpi slt, %44, %45 : vector<128x32xi32>
      %47 = arith.andi %42, %46 : vector<128x32xi1>
      %cst_20 = arith.constant 0.000000e+00 : f32
      %48 = vector.broadcast %cst_20 : f32 to vector<128x32xf32>
      %49 = arith.select %47, %37, %48 : vector<128x32xi1>, vector<128x32xf32>
      %50 = tpu.concatenate %36, %23, %49 in 1 : vector<128x32xf32>, vector<128x32xf32>, vector<128x32xf32> -> vector<128x96xf32>
      %51 = arith.truncf %50 : vector<128x96xf32> to vector<128x96xbf16>
      %c0_21 = arith.constant 0 : index
      %c0_22 = arith.constant 0 : index
      %52 = vector.load %arg3[%c0_21, %c0_22] : memref<96x32xf32, #tpu.memory_space<vmem>>, vector<96x32xf32>
      %53 = arith.truncf %52 : vector<96x32xf32> to vector<96x32xbf16>
      %cst_23 = arith.constant dense<0.000000e+00> : vector<128x32xf32>
      %54 = tpu.matmul %51, %53, %cst_23 {dimension_numbers = #tpu.dot_dimension_numbers<[1], [0], [0], [1], [0, 0, 1, 1], [], []>} : vector<128x96xbf16>, vector<96x32xbf16>, vector<128x32xf32> -> vector<128x32xf32>
      %c0_24 = arith.constant 0 : index
      %c0_25 = arith.constant 0 : index
      %55 = vector.load %arg4[%c0_24, %c0_25] : memref<1x32xf32, #tpu.memory_space<vmem>>, vector<1x32xf32>
      %56 = vector.broadcast %55 : vector<1x32xf32> to vector<128x32xf32>
      %57 = arith.addf %54, %56 : vector<128x32xf32>
      %cst_26 = arith.constant 0.000000e+00 : f32
      %58 = vector.broadcast %cst_26 : f32 to vector<128x32xf32>
      %59 = arith.maximumf %57, %58 : vector<128x32xf32>
      %cst_27 = arith.constant dense<0.000000e+00> : vector<128xf32>
      %60 = vector.multi_reduction <add>, %59, %cst_27 [1] : vector<128x32xf32> to vector<128xf32>
      %61 = vector.shape_cast %60 : vector<128xf32> to vector<128x1xf32>
      %cst_28 = arith.constant 3.200000e+01 : f32
      %62 = vector.broadcast %cst_28 : f32 to vector<128x1xf32>
      %63 = arith.divf %61, %62 : vector<128x1xf32>
      %64 = vector.broadcast %63 : vector<128x1xf32> to vector<128x32xf32>
      %65 = arith.subf %59, %64 : vector<128x32xf32>
      %66 = arith.mulf %65, %65 : vector<128x32xf32>
      %cst_29 = arith.constant dense<0.000000e+00> : vector<128xf32>
      %67 = vector.multi_reduction <add>, %66, %cst_29 [1] : vector<128x32xf32> to vector<128xf32>
      %68 = vector.shape_cast %67 : vector<128xf32> to vector<128x1xf32>
      %cst_30 = arith.constant 3.200000e+01 : f32
      %69 = vector.broadcast %cst_30 : f32 to vector<128x1xf32>
      %70 = arith.divf %68, %69 : vector<128x1xf32>
      %71 = vector.broadcast %63 : vector<128x1xf32> to vector<128x32xf32>
      %72 = arith.subf %59, %71 : vector<128x32xf32>
      %cst_31 = arith.constant 9.99999974E-6 : f32
      %73 = vector.broadcast %cst_31 : f32 to vector<128x1xf32>
      %74 = arith.addf %70, %73 : vector<128x1xf32>
      %75 = math.rsqrt %74 : vector<128x1xf32>
      %76 = vector.broadcast %75 : vector<128x1xf32> to vector<128x32xf32>
      %77 = arith.mulf %72, %76 : vector<128x32xf32>
      %c0_32 = arith.constant 0 : index
      %c0_33 = arith.constant 0 : index
      %78 = vector.load %arg5[%c0_32, %c0_33] : memref<1x32xf32, #tpu.memory_space<vmem>>, vector<1x32xf32>
      %79 = vector.broadcast %78 : vector<1x32xf32> to vector<128x32xf32>
      %80 = arith.mulf %77, %79 : vector<128x32xf32>
      %c0_34 = arith.constant 0 : index
      %c0_35 = arith.constant 0 : index
      %81 = vector.load %arg6[%c0_34, %c0_35] : memref<1x32xf32, #tpu.memory_space<vmem>>, vector<1x32xf32>
      %82 = vector.broadcast %81 : vector<1x32xf32> to vector<128x32xf32>
      %83 = arith.addf %80, %82 : vector<128x32xf32>
      %84 = tpu.iota {dimensions = array<i32: 0>} : vector<128x32xi32>
      %c8_i32 = arith.constant 8 : i32
      %85 = vector.broadcast %c8_i32 : i32 to vector<128x32xi32>
      %86 = arith.cmpi slt, %84, %85 : vector<128x32xi32>
      %cst_36 = arith.constant 0.000000e+00 : f32
      %87 = vector.broadcast %cst_36 : f32 to vector<128x32xf32>
      %88 = arith.select %86, %83, %87 : vector<128x32xi1>, vector<128x32xf32>
      %c1_i32_37 = arith.constant 1 : i32
      %89 = tpu.dynamic_rotate %88 by %c1_i32_37 dim 0 : vector<128x32xf32>, i32 -> vector<128x32xf32>
      %90 = tpu.iota {dimensions = array<i32: 0>} : vector<128x32xi32>
      %c-1_i32_38 = arith.constant -1 : i32
      %91 = vector.broadcast %c-1_i32_38 : i32 to vector<128x32xi32>
      %92 = arith.addi %90, %91 : vector<128x32xi32>
      %c0_i32_39 = arith.constant 0 : i32
      %93 = vector.broadcast %c0_i32_39 : i32 to vector<128x32xi32>
      %94 = arith.cmpi sge, %92, %93 : vector<128x32xi32>
      %c-1_i32_40 = arith.constant -1 : i32
      %95 = vector.broadcast %c-1_i32_40 : i32 to vector<128x32xi32>
      %96 = arith.addi %90, %95 : vector<128x32xi32>
      %c128_i32_41 = arith.constant 128 : i32
      %97 = vector.broadcast %c128_i32_41 : i32 to vector<128x32xi32>
      %98 = arith.cmpi slt, %96, %97 : vector<128x32xi32>
      %99 = arith.andi %94, %98 : vector<128x32xi1>
      %cst_42 = arith.constant 0.000000e+00 : f32
      %100 = vector.broadcast %cst_42 : f32 to vector<128x32xf32>
      %101 = arith.select %99, %89, %100 : vector<128x32xi1>, vector<128x32xf32>
      %c127_i32_43 = arith.constant 127 : i32
      %102 = tpu.dynamic_rotate %88 by %c127_i32_43 dim 0 : vector<128x32xf32>, i32 -> vector<128x32xf32>
      %103 = tpu.iota {dimensions = array<i32: 0>} : vector<128x32xi32>
      %c1_i32_44 = arith.constant 1 : i32
      %104 = vector.broadcast %c1_i32_44 : i32 to vector<128x32xi32>
      %105 = arith.addi %103, %104 : vector<128x32xi32>
      %c0_i32_45 = arith.constant 0 : i32
      %106 = vector.broadcast %c0_i32_45 : i32 to vector<128x32xi32>
      %107 = arith.cmpi sge, %105, %106 : vector<128x32xi32>
      %c1_i32_46 = arith.constant 1 : i32
      %108 = vector.broadcast %c1_i32_46 : i32 to vector<128x32xi32>
      %109 = arith.addi %103, %108 : vector<128x32xi32>
      %c128_i32_47 = arith.constant 128 : i32
      %110 = vector.broadcast %c128_i32_47 : i32 to vector<128x32xi32>
      %111 = arith.cmpi slt, %109, %110 : vector<128x32xi32>
      %112 = arith.andi %107, %111 : vector<128x32xi1>
      %cst_48 = arith.constant 0.000000e+00 : f32
      %113 = vector.broadcast %cst_48 : f32 to vector<128x32xf32>
      %114 = arith.select %112, %102, %113 : vector<128x32xi1>, vector<128x32xf32>
      %115 = tpu.concatenate %101, %88, %114 in 1 : vector<128x32xf32>, vector<128x32xf32>, vector<128x32xf32> -> vector<128x96xf32>
      %116 = arith.truncf %115 : vector<128x96xf32> to vector<128x96xbf16>
      %c0_49 = arith.constant 0 : index
      %c0_50 = arith.constant 0 : index
      %117 = vector.load %arg7[%c0_49, %c0_50] : memref<96x32xf32, #tpu.memory_space<vmem>>, vector<96x32xf32>
      %118 = arith.truncf %117 : vector<96x32xf32> to vector<96x32xbf16>
      %cst_51 = arith.constant dense<0.000000e+00> : vector<128x32xf32>
      %119 = tpu.matmul %116, %118, %cst_51 {dimension_numbers = #tpu.dot_dimension_numbers<[1], [0], [0], [1], [0, 0, 1, 1], [], []>} : vector<128x96xbf16>, vector<96x32xbf16>, vector<128x32xf32> -> vector<128x32xf32>
      %c0_52 = arith.constant 0 : index
      %c0_53 = arith.constant 0 : index
      %120 = vector.load %arg8[%c0_52, %c0_53] : memref<1x32xf32, #tpu.memory_space<vmem>>, vector<1x32xf32>
      %121 = vector.broadcast %120 : vector<1x32xf32> to vector<128x32xf32>
      %122 = arith.addf %119, %121 : vector<128x32xf32>
      %cst_54 = arith.constant 0.000000e+00 : f32
      %123 = vector.broadcast %cst_54 : f32 to vector<128x32xf32>
      %124 = arith.maximumf %122, %123 : vector<128x32xf32>
      %cst_55 = arith.constant dense<0.000000e+00> : vector<128xf32>
      %125 = vector.multi_reduction <add>, %124, %cst_55 [1] : vector<128x32xf32> to vector<128xf32>
      %126 = vector.shape_cast %125 : vector<128xf32> to vector<128x1xf32>
      %cst_56 = arith.constant 3.200000e+01 : f32
      %127 = vector.broadcast %cst_56 : f32 to vector<128x1xf32>
      %128 = arith.divf %126, %127 : vector<128x1xf32>
      %129 = vector.broadcast %128 : vector<128x1xf32> to vector<128x32xf32>
      %130 = arith.subf %124, %129 : vector<128x32xf32>
      %131 = arith.mulf %130, %130 : vector<128x32xf32>
      %cst_57 = arith.constant dense<0.000000e+00> : vector<128xf32>
      %132 = vector.multi_reduction <add>, %131, %cst_57 [1] : vector<128x32xf32> to vector<128xf32>
      %133 = vector.shape_cast %132 : vector<128xf32> to vector<128x1xf32>
      %cst_58 = arith.constant 3.200000e+01 : f32
      %134 = vector.broadcast %cst_58 : f32 to vector<128x1xf32>
      %135 = arith.divf %133, %134 : vector<128x1xf32>
      %136 = vector.broadcast %128 : vector<128x1xf32> to vector<128x32xf32>
      %137 = arith.subf %124, %136 : vector<128x32xf32>
      %cst_59 = arith.constant 9.99999974E-6 : f32
      %138 = vector.broadcast %cst_59 : f32 to vector<128x1xf32>
      %139 = arith.addf %135, %138 : vector<128x1xf32>
      %140 = math.rsqrt %139 : vector<128x1xf32>
      %141 = vector.broadcast %140 : vector<128x1xf32> to vector<128x32xf32>
      %142 = arith.mulf %137, %141 : vector<128x32xf32>
      %c0_60 = arith.constant 0 : index
      %c0_61 = arith.constant 0 : index
      %143 = vector.load %arg9[%c0_60, %c0_61] : memref<1x32xf32, #tpu.memory_space<vmem>>, vector<1x32xf32>
      %144 = vector.broadcast %143 : vector<1x32xf32> to vector<128x32xf32>
      %145 = arith.mulf %142, %144 : vector<128x32xf32>
      %c0_62 = arith.constant 0 : index
      %c0_63 = arith.constant 0 : index
      %146 = vector.load %arg10[%c0_62, %c0_63] : memref<1x32xf32, #tpu.memory_space<vmem>>, vector<1x32xf32>
      %147 = vector.broadcast %146 : vector<1x32xf32> to vector<128x32xf32>
      %148 = arith.addf %145, %147 : vector<128x32xf32>
      %149 = tpu.iota {dimensions = array<i32: 0>} : vector<128x32xi32>
      %c8_i32_64 = arith.constant 8 : i32
      %150 = vector.broadcast %c8_i32_64 : i32 to vector<128x32xi32>
      %151 = arith.cmpi slt, %149, %150 : vector<128x32xi32>
      %cst_65 = arith.constant 0.000000e+00 : f32
      %152 = vector.broadcast %cst_65 : f32 to vector<128x32xf32>
      %153 = arith.select %151, %148, %152 : vector<128x32xi1>, vector<128x32xf32>
      %c0_66 = arith.constant 0 : index
      %c0_67 = arith.constant 0 : index
      %154 = vector.load %arg11[%c0_66, %c0_67] : memref<1x32xf32, #tpu.memory_space<vmem>>, vector<1x32xf32>
      %cst_68 = arith.constant dense<0.000000e+00> : vector<1x128xf32>
      %155 = tpu.matmul %154, %153, %cst_68 {dimension_numbers = #tpu.dot_dimension_numbers<[1], [1], [0], [0], [0, 0, 1, 0], [], []>} : vector<1x32xf32>, vector<128x32xf32>, vector<1x128xf32> -> vector<1x128xf32>
      %c0_69 = arith.constant 0 : index
      %c0_70 = arith.constant 0 : index
      %156 = vector.load %arg12[%c0_69, %c0_70] : memref<1x1xf32, #tpu.memory_space<vmem>>, vector<1x1xf32>
      %157 = vector.broadcast %156 : vector<1x1xf32> to vector<1x128xf32>
      %158 = arith.addf %155, %157 : vector<1x128xf32>
      %159 = tpu.iota {dimensions = array<i32: 1>} : vector<1x128xi32>
      %c8_i32_71 = arith.constant 8 : i32
      %160 = vector.broadcast %c8_i32_71 : i32 to vector<1x128xi32>
      %161 = arith.cmpi slt, %159, %160 : vector<1x128xi32>
      %162 = math.exp %158 : vector<1x128xf32>
      %cst_72 = arith.constant 1.000000e+00 : f32
      %163 = vector.broadcast %cst_72 : f32 to vector<1x128xf32>
      %164 = arith.mulf %162, %163 : vector<1x128xf32>
      %cst_73 = arith.constant 0.000000e+00 : f32
      %165 = vector.broadcast %cst_73 : f32 to vector<1x128xf32>
      %166 = arith.select %161, %164, %165 : vector<1x128xi1>, vector<1x128xf32>
      %167 = math.floor %166 : vector<1x128xf32>
      %cst_74 = arith.constant 5.000000e-01 : f32
      %168 = vector.broadcast %cst_74 : f32 to vector<1x128xf32>
      %169 = arith.addf %166, %168 : vector<1x128xf32>
      %170 = math.floor %169 : vector<1x128xf32>
      %171 = arith.subf %166, %167 : vector<1x128xf32>
      %cst_75 = arith.constant 5.000000e-01 : f32
      %172 = vector.broadcast %cst_75 : f32 to vector<1x128xf32>
      %173 = arith.cmpf oeq, %171, %172 : vector<1x128xf32>
      %cst_76 = arith.constant 5.000000e-01 : f32
      %174 = vector.broadcast %cst_76 : f32 to vector<1x128xf32>
      %175 = arith.mulf %167, %174 : vector<1x128xf32>
      %176 = math.floor %175 : vector<1x128xf32>
      %cst_77 = arith.constant 2.000000e+00 : f32
      %177 = vector.broadcast %cst_77 : f32 to vector<1x128xf32>
      %178 = arith.mulf %176, %177 : vector<1x128xf32>
      %179 = arith.cmpf oeq, %178, %167 : vector<1x128xf32>
      %180 = arith.andi %173, %179 : vector<1x128xi1>
      %181 = arith.select %180, %167, %170 : vector<1x128xi1>, vector<1x128xf32>
      %c0_78 = arith.constant 0 : index
      %c0_79 = arith.constant 0 : index
      %c0_80 = arith.constant 0 : index
      %182 = vector.load %arg15[%c0_78, %c0_79, %c0_80] : memref<1x1x128xf32, #tpu.memory_space<vmem>>, vector<1x1x128xf32>
      %183 = vector.shape_cast %182 : vector<1x1x128xf32> to vector<1x128xf32>
      %184 = vector.shape_cast %166 : vector<1x128xf32> to vector<1x1x128xf32>
      tpu.vector_store %arg15[%c0_78, %c0_79, %c0_80], %184 {strides = array<i32>} : memref<1x1x128xf32, #tpu.memory_space<vmem>>, vector<1x1x128xf32>,
      %185 = arith.fptosi %181 : vector<1x128xf32> to vector<1x128xi32>
      %c0_81 = arith.constant 0 : index
      %c0_82 = arith.constant 0 : index
      %c0_83 = arith.constant 0 : index
      %186 = vector.load %arg14[%c0_81, %c0_82, %c0_83] : memref<1x1x128xi32, #tpu.memory_space<vmem>>, vector<1x1x128xi32>
      %187 = vector.shape_cast %186 : vector<1x1x128xi32> to vector<1x128xi32>
      %188 = vector.shape_cast %185 : vector<1x128xi32> to vector<1x1x128xi32>
      tpu.vector_store %arg14[%c0_81, %c0_82, %c0_83], %188 {strides = array<i32>} : memref<1x1x128xi32, #tpu.memory_space<vmem>>, vector<1x1x128xi32>,
      %c1_i32_84 = arith.constant 1 : i32
      %189 = vector.broadcast %c1_i32_84 : i32 to vector<1x128xi32>
      %190 = arith.cmpi sge, %159, %189 : vector<1x128xi32>
      %c1_i32_85 = arith.constant 1 : i32
      %191 = tpu.dynamic_rotate %181 by %c1_i32_85 dim 1 : vector<1x128xf32>, i32 -> vector<1x128xf32>
      %cst_86 = arith.constant 0.000000e+00 : f32
      %192 = vector.broadcast %cst_86 : f32 to vector<1x128xf32>
      %193 = arith.select %190, %191, %192 : vector<1x128xi1>, vector<1x128xf32>
      %194 = arith.addf %181, %193 : vector<1x128xf32>
      %c2_i32 = arith.constant 2 : i32
      %195 = vector.broadcast %c2_i32 : i32 to vector<1x128xi32>
      %196 = arith.cmpi sge, %159, %195 : vector<1x128xi32>
      %c2_i32_87 = arith.constant 2 : i32
      %197 = tpu.dynamic_rotate %194 by %c2_i32_87 dim 1 : vector<1x128xf32>, i32 -> vector<1x128xf32>
      %cst_88 = arith.constant 0.000000e+00 : f32
      %198 = vector.broadcast %cst_88 : f32 to vector<1x128xf32>
      %199 = arith.select %196, %197, %198 : vector<1x128xi1>, vector<1x128xf32>
      %200 = arith.addf %194, %199 : vector<1x128xf32>
      %c4_i32 = arith.constant 4 : i32
      %201 = vector.broadcast %c4_i32 : i32 to vector<1x128xi32>
      %202 = arith.cmpi sge, %159, %201 : vector<1x128xi32>
      %c4_i32_89 = arith.constant 4 : i32
      %203 = tpu.dynamic_rotate %200 by %c4_i32_89 dim 1 : vector<1x128xf32>, i32 -> vector<1x128xf32>
      %cst_90 = arith.constant 0.000000e+00 : f32
      %204 = vector.broadcast %cst_90 : f32 to vector<1x128xf32>
      %205 = arith.select %202, %203, %204 : vector<1x128xi1>, vector<1x128xf32>
      %206 = arith.addf %200, %205 : vector<1x128xf32>
      %c8_i32_91 = arith.constant 8 : i32
      %207 = vector.broadcast %c8_i32_91 : i32 to vector<1x128xi32>
      %208 = arith.cmpi sge, %159, %207 : vector<1x128xi32>
      %c8_i32_92 = arith.constant 8 : i32
      %209 = tpu.dynamic_rotate %206 by %c8_i32_92 dim 1 : vector<1x128xf32>, i32 -> vector<1x128xf32>
      %cst_93 = arith.constant 0.000000e+00 : f32
      %210 = vector.broadcast %cst_93 : f32 to vector<1x128xf32>
      %211 = arith.select %208, %209, %210 : vector<1x128xi1>, vector<1x128xf32>
      %212 = arith.addf %206, %211 : vector<1x128xf32>
      %c16_i32 = arith.constant 16 : i32
      %213 = vector.broadcast %c16_i32 : i32 to vector<1x128xi32>
      %214 = arith.cmpi sge, %159, %213 : vector<1x128xi32>
      %c16_i32_94 = arith.constant 16 : i32
      %215 = tpu.dynamic_rotate %212 by %c16_i32_94 dim 1 : vector<1x128xf32>, i32 -> vector<1x128xf32>
      %cst_95 = arith.constant 0.000000e+00 : f32
      %216 = vector.broadcast %cst_95 : f32 to vector<1x128xf32>
      %217 = arith.select %214, %215, %216 : vector<1x128xi1>, vector<1x128xf32>
      %218 = arith.addf %212, %217 : vector<1x128xf32>
      %c32_i32_96 = arith.constant 32 : i32
      %219 = vector.broadcast %c32_i32_96 : i32 to vector<1x128xi32>
      %220 = arith.cmpi sge, %159, %219 : vector<1x128xi32>
      %c32_i32_97 = arith.constant 32 : i32
      %221 = tpu.dynamic_rotate %218 by %c32_i32_97 dim 1 : vector<1x128xf32>, i32 -> vector<1x128xf32>
      %cst_98 = arith.constant 0.000000e+00 : f32
      %222 = vector.broadcast %cst_98 : f32 to vector<1x128xf32>
      %223 = arith.select %220, %221, %222 : vector<1x128xi1>, vector<1x128xf32>
      %224 = arith.addf %218, %223 : vector<1x128xf32>
      %c64_i32 = arith.constant 64 : i32
      %225 = vector.broadcast %c64_i32 : i32 to vector<1x128xi32>
      %226 = arith.cmpi sge, %159, %225 : vector<1x128xi32>
      %c64_i32_99 = arith.constant 64 : i32
      %227 = tpu.dynamic_rotate %224 by %c64_i32_99 dim 1 : vector<1x128xf32>, i32 -> vector<1x128xf32>
      %cst_100 = arith.constant 0.000000e+00 : f32
      %228 = vector.broadcast %cst_100 : f32 to vector<1x128xf32>
      %229 = arith.select %226, %227, %228 : vector<1x128xi1>, vector<1x128xf32>
      %230 = arith.addf %224, %229 : vector<1x128xf32>
      %c1_i32_101 = arith.constant 1 : i32
      %231 = vector.broadcast %c1_i32_101 : i32 to vector<1x128xi32>
      %232 = arith.cmpi sge, %159, %231 : vector<1x128xi32>
      %c1_i32_102 = arith.constant 1 : i32
      %233 = tpu.dynamic_rotate %230 by %c1_i32_102 dim 1 : vector<1x128xf32>, i32 -> vector<1x128xf32>
      %cst_103 = arith.constant 0.000000e+00 : f32
      %234 = vector.broadcast %cst_103 : f32 to vector<1x128xf32>
      %235 = arith.select %232, %233, %234 : vector<1x128xi1>, vector<1x128xf32>
      %cst_104 = arith.constant 6.400000e+01 : f32
      %236 = vector.broadcast %cst_104 : f32 to vector<1x128xf32>
      %237 = arith.minimumf %230, %236 : vector<1x128xf32>
      %238 = arith.fptosi %237 : vector<1x128xf32> to vector<1x128xi32>
      %c0_105 = arith.constant 0 : index
      %c0_106 = arith.constant 0 : index
      %239 = vector.load %arg17[%c0_105, %c0_106] : memref<1x128xi32, #tpu.memory_space<vmem>>, vector<1x128xi32>
      tpu.vector_store %arg17[%c0_105, %c0_106], %238 {strides = array<i32>} : memref<1x128xi32, #tpu.memory_space<vmem>>, vector<1x128xi32>,
      %cst_107 = arith.constant 6.400000e+01 : f32
      %240 = vector.broadcast %cst_107 : f32 to vector<1x128xf32>
      %241 = arith.minimumf %235, %240 : vector<1x128xf32>
      %242 = arith.fptosi %241 : vector<1x128xf32> to vector<1x128xi32>
      %c0_108 = arith.constant 0 : index
      %c0_109 = arith.constant 0 : index
      %243 = vector.load %arg16[%c0_108, %c0_109] : memref<1x128xi32, #tpu.memory_space<vmem>>, vector<1x128xi32>
      tpu.vector_store %arg16[%c0_108, %c0_109], %242 {strides = array<i32>} : memref<1x128xi32, #tpu.memory_space<vmem>>, vector<1x128xi32>,
    } else {
    }
    %3 = tpu.iota {dimensions = array<i32: 0>} : vector<32x128xi32>
    %c32_i32 = arith.constant 32 : i32
    %4 = arith.muli %arg1, %c32_i32 : i32
    %5 = vector.broadcast %4 : i32 to vector<32x128xi32>
    %6 = arith.addi %3, %5 : vector<32x128xi32>
    %c0 = arith.constant 0 : index
    %c0_1 = arith.constant 0 : index
    %7 = vector.load %arg16[%c0, %c0_1] : memref<1x128xi32, #tpu.memory_space<vmem>>, vector<1x128xi32>
    %8 = vector.broadcast %7 : vector<1x128xi32> to vector<32x128xi32>
    %9 = arith.cmpi sge, %6, %8 : vector<32x128xi32>
    %c0_2 = arith.constant 0 : index
    %c0_3 = arith.constant 0 : index
    %10 = vector.load %arg17[%c0_2, %c0_3] : memref<1x128xi32, #tpu.memory_space<vmem>>, vector<1x128xi32>
    %11 = vector.broadcast %10 : vector<1x128xi32> to vector<32x128xi32>
    %12 = arith.cmpi slt, %6, %11 : vector<32x128xi32>
    %13 = arith.andi %9, %12 : vector<32x128xi1>
    %14 = arith.extui %13 : vector<32x128xi1> to vector<32x128xi32>
    %15 = arith.sitofp %14 : vector<32x128xi32> to vector<32x128xf32>
    %c0_4 = arith.constant 0 : index
    %c0_5 = arith.constant 0 : index
    %c0_6 = arith.constant 0 : index
    %16 = vector.load %arg2[%c0_4, %c0_5, %c0_6] : memref<1x128x32xf32, #tpu.memory_space<vmem>>, vector<1x128x32xf32>
    %17 = vector.shape_cast %16 : vector<1x128x32xf32> to vector<128x32xf32>
    %cst = arith.constant dense<0.000000e+00> : vector<32x32xf32>
    %18 = tpu.matmul %15, %17, %cst {dimension_numbers = #tpu.dot_dimension_numbers<[1], [0], [0], [1], [0, 0, 1, 1], [], []>, precision = #tpu.contract_precision<fp32>} : vector<32x128xf32>, vector<128x32xf32>, vector<32x32xf32> -> vector<32x32xf32>
    %c0_7 = arith.constant 0 : index
    %c0_8 = arith.constant 0 : index
    %c0_9 = arith.constant 0 : index
    %19 = vector.load %arg13[%c0_7, %c0_8, %c0_9] : memref<1x32x32xf32, #tpu.memory_space<vmem>>, vector<1x32x32xf32>
    %20 = vector.shape_cast %19 : vector<1x32x32xf32> to vector<32x32xf32>
    %21 = vector.shape_cast %18 : vector<32x32xf32> to vector<1x32x32xf32>
    tpu.vector_store %arg13[%c0_7, %c0_8, %c0_9], %21 {strides = array<i32>} : memref<1x32x32xf32, #tpu.memory_space<vmem>>, vector<1x32x32xf32>,
    return
  }
  func.func @transform_0(%arg0: i32, %arg1: i32) -> (i32, i32, i32) {
    %c0_i32 = arith.constant 0 : i32
    %c0_i32_0 = arith.constant 0 : i32
    %c0_i32_1 = arith.constant 0 : i32
    return %arg0, %c0_i32, %c0_i32_0 : i32, i32, i32
  }
  func.func @transform_1(%arg0: i32, %arg1: i32) -> (i32, i32) {
    %c0_i32 = arith.constant 0 : i32
    %c0_i32_0 = arith.constant 0 : i32
    %c0_i32_1 = arith.constant 0 : i32
    return %c0_i32, %c0_i32_0 : i32, i32
  }
  func.func @transform_2(%arg0: i32, %arg1: i32) -> (i32, i32) {
    %c0_i32 = arith.constant 0 : i32
    %c0_i32_0 = arith.constant 0 : i32
    %c0_i32_1 = arith.constant 0 : i32
    return %c0_i32, %c0_i32_0 : i32, i32
  }
  func.func @transform_3(%arg0: i32, %arg1: i32) -> (i32, i32) {
    %c0_i32 = arith.constant 0 : i32
    %c0_i32_0 = arith.constant 0 : i32
    %c0_i32_1 = arith.constant 0 : i32
    return %c0_i32, %c0_i32_0 : i32, i32
  }
  func.func @transform_4(%arg0: i32, %arg1: i32) -> (i32, i32) {
    %c0_i32 = arith.constant 0 : i32
    %c0_i32_0 = arith.constant 0 : i32
    %c0_i32_1 = arith.constant 0 : i32
    return %c0_i32, %c0_i32_0 : i32, i32
  }
  func.func @transform_5(%arg0: i32, %arg1: i32) -> (i32, i32) {
    %c0_i32 = arith.constant 0 : i32
    %c0_i32_0 = arith.constant 0 : i32
    %c0_i32_1 = arith.constant 0 : i32
    return %c0_i32, %c0_i32_0 : i32, i32
  }
  func.func @transform_6(%arg0: i32, %arg1: i32) -> (i32, i32) {
    %c0_i32 = arith.constant 0 : i32
    %c0_i32_0 = arith.constant 0 : i32
    %c0_i32_1 = arith.constant 0 : i32
    return %c0_i32, %c0_i32_0 : i32, i32
  }
  func.func @transform_7(%arg0: i32, %arg1: i32) -> (i32, i32) {
    %c0_i32 = arith.constant 0 : i32
    %c0_i32_0 = arith.constant 0 : i32
    %c0_i32_1 = arith.constant 0 : i32
    return %c0_i32, %c0_i32_0 : i32, i32
  }
  func.func @transform_8(%arg0: i32, %arg1: i32) -> (i32, i32) {
    %c0_i32 = arith.constant 0 : i32
    %c0_i32_0 = arith.constant 0 : i32
    %c0_i32_1 = arith.constant 0 : i32
    return %c0_i32, %c0_i32_0 : i32, i32
  }
  func.func @transform_9(%arg0: i32, %arg1: i32) -> (i32, i32) {
    %c0_i32 = arith.constant 0 : i32
    %c0_i32_0 = arith.constant 0 : i32
    %c0_i32_1 = arith.constant 0 : i32
    return %c0_i32, %c0_i32_0 : i32, i32
  }
  func.func @transform_10(%arg0: i32, %arg1: i32) -> (i32, i32) {
    %c0_i32 = arith.constant 0 : i32
    %c0_i32_0 = arith.constant 0 : i32
    %c0_i32_1 = arith.constant 0 : i32
    return %c0_i32, %c0_i32_0 : i32, i32
  }
  func.func @transform_11(%arg0: i32, %arg1: i32) -> (i32, i32, i32) {
    %c0_i32 = arith.constant 0 : i32
    %c0_i32_0 = arith.constant 0 : i32
    return %arg0, %arg1, %c0_i32 : i32, i32, i32
  }
  func.func @transform_12(%arg0: i32, %arg1: i32) -> (i32, i32, i32) {
    %c0_i32 = arith.constant 0 : i32
    %c0_i32_0 = arith.constant 0 : i32
    %c0_i32_1 = arith.constant 0 : i32
    return %arg0, %c0_i32, %c0_i32_0 : i32, i32, i32
  }
  func.func @transform_13(%arg0: i32, %arg1: i32) -> (i32, i32, i32) {
    %c0_i32 = arith.constant 0 : i32
    %c0_i32_0 = arith.constant 0 : i32
    %c0_i32_1 = arith.constant 0 : i32
    return %arg0, %c0_i32, %c0_i32_0 : i32, i32, i32
  }
}

</mosaic_0001>

<bundles_post_ra>
// kernel: tpu_custom_call.1
= control target key start
LH: loop header
LB: loop body
LE: loop exit
PB: predicated region body
PF: predicated region fallthrough
CT: control target
= control target key end

     0   :  { %s5551_s0 = inlined_call_operand.vmem [shape: f32[2,128,32], index: 0, kind: input, shape index: {}]   ;;  %s5552_s1 = inlined_call_operand.vmem [shape: f32[96,32], index: 1, kind: input, shape index: {}]   ;;  %s5553_s2 = inlined_call_operand.vmem [shape: f32[1,32], index: 2, kind: input, shape index: {}]   ;;  %s5554_s3 = inlined_call_operand.vmem [shape: f32[1,32], index: 3, kind: input, shape index: {}]   ;;  %s5555_s4 = inlined_call_operand.vmem [shape: f32[1,32], index: 4, kind: input, shape index: {}]   ;;  %s5556_s5 = inlined_call_operand.vmem [shape: f32[96,32], index: 5, kind: input, shape index: {}]   ;;  %s5557_s6 = inlined_call_operand.vmem [shape: f32[1,32], index: 6, kind: input, shape index: {}]   ;;  %s5558_s7 = inlined_call_operand.vmem [shape: f32[1,32], index: 7, kind: input, shape index: {}]   ;;  %s5559_s8 = inlined_call_operand.vmem [shape: f32[1,32], index: 8, kind: input, shape index: {}]   ;;  %s5560_s9 = inlined_call_operand.vmem [shape: f32[1,32], index: 9, kind: input, shape index: {}]   ;;  %s5561_s10 = inlined_call_operand.<no memory space> [shape: f32[1,1], index: 10, kind: input, shape index: {}]   ;;  %s5562_s11 = inlined_call_operand.vmem [shape: f32[2,64,32], index: 11, kind: output, shape index: {0}]   ;;  %s5563_s12 = inlined_call_operand.hbm [shape: s32[2,1,128], index: 12, kind: output, shape index: {1}]   ;;  %s5564_s13 = inlined_call_operand.hbm [shape: f32[2,1,128], index: 13, kind: output, shape index: {2}]  }
   0x1   :  { %v19_v0 = vstv %s5561_s10 }
   0x2   :  { %20 = vst [vmem:[#allocation4] sm:$0x1] %v19_v0 }
   0x3   :  { %21 = vsyncpa [#allocation6], 0 }
   0x4   :  { %23 = vsyncpa [#allocation6 + $0x1], 0 }
   0x5   :  { %24 = vsyncpa [#allocation8], 0 }
   0x6   :  { %26 = vsyncpa [#allocation8 + $0x1], 0  ;;  %s4453_s27 = smov 0   ;;  %s4455_s28 = smov 0  }
   0x7   :  { %s4457_s29 = smov 0   ;;  %s4459_s30 = smov 0  }
   0x8   :  { %s4461_s14 = smov 0   ;;  %s4463_s15 = smov 0  }
   0x9   :  { %s4465_s16 = smov 0   ;;  %s4467_s10 = smov 0  }
   0xa LB: > { %5574 = sst [smem:[#allocation11_spill]] %s4336_s27  ;;  %s3267_s17 = sadd.s32 4294967295, %s4364_s10   ;;  %s4364_s10 = sphi %s4467_s10, %s32_s10   ;;  %s4360_s16 = sphi %s4465_s16, %s5607_s16   ;;  %s4356_s15 = sphi %s4463_s15, %s5606_s15   ;;  %s4352_s14 = sphi %s4461_s14, %s5605_s14   ;;  %s4348_s30 = sphi %s4459_s30, %s5604_s30   ;;  %s4344_s29 = sphi %s4457_s29, %s5603_s29   ;;  %s4340_s28 = sphi %s4455_s28, %s5602_s28   ;;  %s4336_s27 = sphi %s4453_s27, %s5601_s27  }
   0xb   : > { %5575 = sst [smem:[#allocation12_spill]] %s4340_s28  ;;  %s3268_s18 = sadd.s32 4294967294, %s4364_s10  }
   0xc   : > { %5576 = sst [smem:[#allocation13_spill]] %s4344_s29  ;;  %s41_s19 = sadd.s32 1, %s4356_s15 }
   0xd   : > { %5577 = sst [smem:[#allocation14_spill]] %s4356_s15  ;;  %p42_p0 = scmp.ge.s32.totalorder %s41_s19, 2 }
   0xe   : > { %5578 = sst [smem:[#allocation15_spill]] %s4360_s16  ;;  %s44_s20 = sadd.s32 1, %s4360_s16 }
   0xf   : > { %5579 = sst [smem:[#allocation16_spill]] %s4364_s10  ;;  %p325_p1 = scmp.ne.s32.totalorder %s4344_s29, %s4340_s28 }
  0x10   : > { %p326_p2 = scmp.eq.s32.totalorder %s3267_s17, 3  ;;  %s5609_s19 = smov (%p42_p0, %s41_s19), 0 }
  0x11   : > { %5580 = sst [smem:[#allocation17_spill]] %s5609_s19  ;;  %s5611_s20 = smov (!%p42_p0, %s44_s20), %s4360_s16 }
  0x12   : > { %p4502_p3 = por %p326_p2, %p325_p1  ;;  %p331_p4 = scmp.ne.s32.totalorder %s4340_s28, %s4336_s27 }
  0x13   : > { %p46_p5 = scmp.ge.s32.totalorder %s5611_s20, 2  ;;  %p332_p6 = scmp.eq.s32.totalorder %s3268_s18, 3 }
  0x14   : > { %p3271_p7 = scmp.ge.s32.totalorder %s4364_s10, 1  ;;  %p414_p8 = scmp.lt.s32.totalorder %s4364_s10, 5 }
  0x15   : > { %s5613_s20 = smov (%p46_p5, %s5611_s20), 0  ;;  %p4512_p9 = por %p332_p6, %p331_p4 }
  0x16   : > { %5582 = sst [smem:[#allocation18_spill]] %s5613_s20  ;;  %p415_p10 = pnand %p3271_p7, %p414_p8 }
  0x17   : > { %s5583_s22 = scalar_select %p4512_p9, 1, 0 }
  0x18   : > { %s312_s23 = ssub.s32 %s4360_s16, %s5613_s20  ;;  %s315_s24 = sadd.s32 1, %s4344_s29 }
  0x19   : > { %5584 = sst [smem:[#allocation19_spill]] %s5583_s22  ;;  %p313_p11 = scmp.eq.s32.totalorder %s312_s23, 0 }
  0x1a   : > { %418 = sbr.rel (%p415_p10) target bundleno = 2867 (0xb33), region = 64  ;;  %s4523_s26 = sand.u32 (!%p415_p10), 1, %s4340_s28  }
  0x1b   : > { %s4520_s25 = scalar_select %p313_p11, %s4344_s29, %s315_s24  }
  0x1c   : > { %p470_p12 = scmp.lt.s32.totalorder (!%p415_p10), %s4352_s14, 1  ;;  %s3274_s18 = sshll.u32 (!%p415_p10), %s4348_s30, 2 }
  0x1d   : > { %5585 = sst [smem:[#allocation20_spill]] %s4520_s25  ;;  %p478_p13 = scmp.lt.s32.totalorder (!%p415_p10), %s3274_s18, 7 }
  0x1e   : > { %p3277_p0 = scmp.ne.s32.totalorder (!%p415_p10), %s4348_s30, 0 }
  0x21   : > { %s471_s17 = scalar_select %p470_p12, %s4352_s14, 1 }
  0x22   : > { %s5615_s18 = smov (!%p478_p13, %s3274_s18), 7  ;;  %489 = sbr.rel (%p3277_p0) target bundleno = 2546 (0x9f2), region = 68 }
  0x23   : > { %s3325_s19 = sshll.u32 %s471_s17, 7  ;;  %s3275_s24 = sshll.u32 %s471_s17, 3  ;;  %v522_v4 = vlaneseq (!%p3277_p0)  ;;  %v919_v9 = vld [vmem:[%s5552_s1] sm:$0xff] (!%p3277_p0)  ;;  %v920_v14 = vld [vmem:[%s5552_s1 + $0x8] sm:$0xff] (!%p3277_p0)  ;;  %v921_v15 = vld [vmem:[%s5552_s1 + $0x10] sm:$0xff] (!%p3277_p0)  ;;  %vm877_vm3 = vcmask (!%p3277_p0), 261120  }
  0x24   : > { %s4531_s23 = scalar_lea.vmem %s5551_s0, %s3325_s19  ;;  %s481_s16 = sadd.s32 %s3275_s24, %s5615_s18  ;;  %v922_v20 = vld [vmem:[%s5552_s1 + $0x18] sm:$0xff] (!%p3277_p0)  ;;  %v931_v22 = vpack.c.bf16 (!%p3277_p0), %v920_v14, %v919_v9  ;;  %v923_v24 = vld [vmem:[%s5552_s1 + $0x20] sm:$0xff] (!%p3277_p0)  ;;  %v924_v25 = vld [vmem:[%s5552_s1 + $0x28] sm:$0xff] (!%p3277_p0)  ;;  %vm894_vm4 = vcmask (!%p3277_p0), 523264   ;;  %vm944_vm5 = vcmask (!%p3277_p0), 785408   ;;  %vm4370_vm7 = vmmov (!%p3277_p0), 0  }
  0x25   : > { %s3276_s25 = sshll.u32 %s481_s16, 3  ;;  %v4542_v1 = vld [vmem:[%s4531_s23] sm:$0xff] (!%p3277_p0)  ;;  %v491_v2 = vld [vmem:[%s4531_s23 + $0x8] sm:$0xff] (!%p3277_p0)  ;;  %v4546_v3 = vld [vmem:[%s4531_s23 + $0x10] sm:$0xff] (!%p3277_p0)  ;;  %v4560_v12 = vshrl.u32 (!%p3277_p0), %v522_v4, 7  ;;  %v932_v23 = vpack.c.bf16 (!%p3277_p0), %v922_v20, %v921_v15  ;;  %v933_v31 = vpack.c.bf16 (!%p3277_p0), %v924_v25, %v923_v24  ;;  %s4367_s19 = smov (!%p3277_p0), 64  }
  0x26   : > { %s4536_s28 = scalar_lea.vmem %s5562_s11, %s3276_s25  ;;  %v637_v5 = vrot.slane (!%p3277_p0), %v491_v2, 1  ;;  %v4071_v6 = vpack.i.bf16 (!%p3277_p0), %v491_v2, %v4542_v1  ;;  %v4550_v7 = vld [vmem:[%s4531_s23 + $0x18] sm:$0xff] (!%p3277_p0)  ;;  %v4553_v8 = vld [vmem:[%s4531_s23 + $0x20] sm:$0xff] (!%p3277_p0)  ;;  %v507_v10 = vrot.slane (!%p3277_p0), %v491_v2, 7  ;;  %v636_v11 = vrot.slane (!%p3277_p0), %v4542_v1, 1  ;;  %s4366_s25 = smov (!%p3277_p0), 32   ;;  %3476 = vmatprep.subr.bf16.mxu0 (!%p3277_p0), %v931_v22 }
  0x27   : > { %v638_v13 = vrot.slane (!%p3277_p0), %v4546_v3, 1  ;;  %v506_v16 = vrot.slane (!%p3277_p0), %v4542_v1, 7  ;;  %v639_v17 = vrot.slane (!%p3277_p0), %v4550_v7, 1  ;;  %v4076_v18 = vpack.i.bf16 (!%p3277_p0), %v4550_v7, %v4546_v3  ;;  %3477 = vmatpush3.bf16.msra.mxu0 (!%p3277_p0), %v931_v22  ;;  %v925_v35 = vld [vmem:[%s5552_s1 + $0x30] sm:$0xff] (!%p3277_p0)  ;;  %v926_v36 = vld [vmem:[%s5552_s1 + $0x38] sm:$0xff] (!%p3277_p0)  ;;  %v927_v38 = vld [vmem:[%s5552_s1 + $0x40] sm:$0xff] (!%p3277_p0) }
  0x28   : > { %4072 = vrot.lane.b32.xlu0 (!%p3277_p0), %v4071_v6, %s4366_s25  ;;  %v640_v19 = vrot.slane (!%p3277_p0), %v4553_v8, 1  ;;  %v508_v21 = vrot.slane (!%p3277_p0), %v4546_v3, 7  ;;  %vm652_vm0 = vcmp.lt.s32.totalorder (!%p3277_p0), %v4560_v12, 7  ;;  %vm524_vm1 = vcmp.lt.s32.totalorder (!%p3277_p0), %v4560_v12, 1  ;;  %3478 = vmatprep.subr.bf16.mxu0 (!%p3277_p0), %v932_v23  ;;  %v928_v39 = vld [vmem:[%s5552_s1 + $0x48] sm:$0xff] (!%p3277_p0)  ;;  %v929_v41 = vld [vmem:[%s5552_s1 + $0x50] sm:$0xff] (!%p3277_p0) }
  0x29   : > { %v666_v26 = vsel %vm652_vm0, %v637_v5, %v638_v13  ;;  %v667_v27 = vsel %vm652_vm0, %v636_v11, %v637_v5  ;;  %v665_v29 = vsel %vm652_vm0, %v638_v13, %v639_v17  ;;  %v539_v34 = vsel %vm524_vm1, %v506_v16, %v507_v10  ;;  %v930_v42 = vld [vmem:[%s5552_s1 + $0x58] sm:$0xff]  ;;  %v3278_v15 = vld [vmem:[%s5553_s2] ss:$0 sm:$0xff]  ;;  %s5586_s27 = scalar_lea.vmem [#allocation7], %s4523_s26  ;;  %s4371_s10 = smov 1  }
  0x2a   : > { %v664_v28 = vsel %vm652_vm0, %v639_v17, %v640_v19  ;;  %v4081_v30 = vpack.i.bf16 %v666_v26, %v667_v27  ;;  %v538_v33 = vsel %vm524_vm1, %v507_v10, %v508_v21  ;;  %v934_v37 = vpack.c.bf16 %v926_v36, %v925_v35  ;;  %v4625_v44 = vld [vmem:[%s4531_s23 + $0x78] sm:$0xff]  ;;  %s5587_s24 = scalar_lea.vmem [#allocation5], %s4523_s26  ;;  %s4372_s29 = smov 2  }
  0x2b   : > { %v4086_v32 = vpack.i.bf16 %v664_v28, %v665_v29  ;;  %3479 = vmatpush3.bf16.msra.mxu0 %v932_v23  ;;  %v935_v40 = vpack.c.bf16 %v928_v39, %v927_v38  ;;  %v936_v43 = vpack.c.bf16 %v930_v42, %v929_v41  ;;  %v521_v45 = vrot.slane %v4625_v44, 7  ;;  %v1636_v36 = vld [vmem:[%s5556_s5 + $0x18] sm:$0xff]  ;;  %v1637_v38 = vld [vmem:[%s5556_s5 + $0x20] sm:$0xff]  ;;  %v1638_v39 = vld [vmem:[%s5556_s5 + $0x28] sm:$0xff]  ;;  %s4373_s15 = smov 4   ;;  %s4374_s16 = smov 8  }
  0x2c   : > { %4077 = vrot.lane.b32.xlu0 %v4076_v18, %s4366_s25  ;;  %4082 = vrot.lane.b32.xlu1 %v4081_v30, %s4367_s19  ;;  %v4629_v46 = vadd.s32 4294967295, %v4560_v12  ;;  %v509_v51 = vrot.slane %v4550_v7, 7  ;;  %v4368_v29 = vmov 0.0   ;;  %v1639_v41 = vld [vmem:[%s5556_s5 + $0x30] sm:$0xff]  ;;  %v1640_v42 = vld [vmem:[%s5556_s5 + $0x38] sm:$0xff]  ;;  %v651_v7 = vrot.slane %v4625_v44, 1 }
  0x2d   : > { %3480 = vmatprep.subr.bf16.mxu0 %v933_v31  ;;  %v540_v47 = vsel %vm524_vm1, %v521_v45, %v506_v16  ;;  %v4662_v30 = vrot.slane %v4368_v29, 1  ;;  %s4375_s20 = smov 16  }
  0x2e   : > { %vm572_vm2 = vcmp.ge.s32.totalorder %v4629_v46, 0  ;;  %v537_v61 = vsel %vm524_vm1, %v508_v21, %v509_v51  ;;  %v4750_v46 = vld [vmem:[%s4531_s23 + $0x30] sm:$0xff] }
  0x2f   : > { %3481 = vmatpush3.bf16.msra.mxu0 %v933_v31  ;;  %v620_v52 = vsel %vm572_vm2, %v540_v47, 0.0  ;;  %v4666_v31 = vpack.i.bf16 %v4662_v30, %v4662_v30 }
  0x30   : > { %4087 = vrot.lane.b32.xlu1 %v4086_v32, %s4367_s19  ;;  %3482 = vmatprep.subr.bf16.mxu0 %v934_v37  ;;  %v1633_v32 = vld [vmem:[%s5556_s5] sm:$0xff] }
  0x33   : > { %3483 = vmatpush3.bf16.msra.mxu0 %v934_v37 }
  0x34   : > { %3484 = vmatprep.subr.bf16.mxu0 %v935_v40 }
  0x37   : > { %3485 = vmatpush3.bf16.msra.mxu0 %v935_v40  ;;  %v1647_v40 = vpack.c.bf16 %v1638_v39, %v1637_v38 }
  0x38   : > { %3486 = vmatprep.subr.bf16.mxu0 %v936_v43 }
  0x3b   : > { %3487 = vmatpush3.bf16.msra.mxu0 %v936_v43  ;;  %v1648_v43 = vpack.c.bf16 %v1640_v42, %v1639_v41 }
  0x3c   : > { %3532 = vmatprep.subr.mxu0 %v4368_v29 }
  0x9a   : > { %v4073_v48 = vpop.permute.xlu0 %4072 }
  0x9b   : > { %v4075_v49 = vunpack.i.h.bf16 %v4073_v48  ;;  %v4074_v50 = vunpack.i.l.bf16 %v4073_v48 }
  0x9d   : > { %v878_v57 = vsel %vm877_vm3, %v620_v52, %v4074_v50  ;;  %v879_v58 = vsel %vm877_vm3, %v539_v34, %v4075_v49  ;;  %v1635_v34 = vld [vmem:[%s5556_s5 + $0x10] sm:$0xff]  ;;  %v1641_v50 = vld [vmem:[%s5556_s5 + $0x40] sm:$0xff]  ;;  %v1642_v52 = vld [vmem:[%s5556_s5 + $0x48] sm:$0xff] }
  0x9e   : > { %v4078_v53 = vpop.permute.xlu0 %4077  ;;  %v4083_v54 = vpop.permute.xlu1 %4082  ;;  %v1646_v37 = vpack.c.bf16 %v1636_v36, %v1635_v34 }
  0x9f   : > { %v4080_v55 = vunpack.i.h.bf16 %v4078_v53  ;;  %v4079_v56 = vunpack.i.l.bf16 %v4078_v53  ;;  %v4085_v59 = vunpack.i.h.bf16 %v4083_v54  ;;  %v4084_v60 = vunpack.i.l.bf16 %v4083_v54  ;;  %v1643_v54 = vld [vmem:[%s5556_s5 + $0x50] sm:$0xff] }
  0xa0   : > { %v1649_v53 = vpack.c.bf16 %v1642_v52, %v1641_v50 }
  0xa1   : > { %v895_v62 = vsel %vm894_vm4, %v878_v57, %v4084_v60  ;;  %v896_v63 = vsel %vm894_vm4, %v879_v58, %v4085_v59  ;;  %v881_v0 = vsel %vm877_vm3, %v537_v61, %v4080_v55  ;;  %v880_v2 = vsel %vm877_vm3, %v538_v33, %v4079_v56  ;;  %v1634_v33 = vld [vmem:[%s5556_s5 + $0x8] sm:$0xff]  ;;  %v1644_v55 = vld [vmem:[%s5556_s5 + $0x58] sm:$0xff]  ;;  %v3287_v57 = vld [vmem:[%s5554_s3] ss:$0 sm:$0xff] }
  0xa2   : > { %v4088_v3 = vpop.permute.xlu1 %4087  ;;  %v911_v5 = vpack.c.bf16 %v896_v63, %v895_v62  ;;  %v1645_v35 = vpack.c.bf16 %v1634_v33, %v1633_v32  ;;  %v1650_v58 = vpack.c.bf16 %v1644_v55, %v1643_v54  ;;  %v3288_v60 = vld [vmem:[%s5555_s4] ss:$0 sm:$0xff]  ;;  %v4773_v55 = vld [vmem:[%s4531_s23 + $0x50] sm:$0xff] }
  0xa3   : > { %v4090_v6 = vunpack.i.h.bf16 %v4088_v3  ;;  %v4089_v9 = vunpack.i.l.bf16 %v4088_v3 }
  0xa4   : > { %3488 = vmatprep.mubr.msk.bf16.mxu0 %vm944_vm5, %v911_v5  ;;  %3504 = vmatprep.subr.bf16.mxu1 %v1645_v35 }
  0xa5   : > { %v898_v10 = vsel %vm894_vm4, %v881_v0, %v4090_v6  ;;  %v897_v13 = vsel %vm894_vm4, %v880_v2, %v4089_v9  ;;  %3505 = vmatpush3.bf16.msra.mxu1 %v1645_v35  ;;  %v4726_v6 = vrot.slane %v4368_v29, 7 }
  0xa6   : > { %v912_v14 = vpack.c.bf16 %v898_v10, %v897_v13  ;;  %3506 = vmatprep.subr.bf16.mxu1 %v1646_v37 }
  0xa8   : > { %3489 = vmatmul.mubr.msk.bf16.vlgmr.msra.gmra.mrb[0].mxu0 %vm944_vm5, %v912_v14 }
  0xa9   : > { %3507 = vmatpush3.bf16.msra.mxu1 %v1646_v37 }
  0xaa   : > { %3508 = vmatprep.subr.bf16.mxu1 %v1647_v40 }
  0xad   : > { %3509 = vmatpush3.bf16.msra.mxu1 %v1647_v40  ;;  %v4753_v40 = vld [vmem:[%s4531_s23 + $0x38] sm:$0xff] }
  0xae   : > { %3510 = vmatprep.subr.bf16.mxu1 %v1648_v43  ;;  %v643_v41 = vrot.slane %v4753_v40, 1  ;;  %v4116_v42 = vpack.i.bf16 %v4753_v40, %v4750_v46 }
  0xb1   : > { %3511 = vmatpush3.bf16.msra.mxu1 %v1648_v43  ;;  %v642_v43 = vrot.slane %v4750_v46, 1 }
  0xb2   : > { %3512 = vmatprep.subr.bf16.mxu1 %v1649_v53 }
  0xb3   : > { %v661_v50 = vsel %vm652_vm0, %v642_v43, %v643_v41 }
  0xb5   : > { %3513 = vmatpush3.bf16.msra.mxu1 %v1649_v53 }
  0xb6   : > { %3514 = vmatprep.subr.bf16.mxu1 %v1650_v58 }
  0xb9   : > { %3515 = vmatpush3.bf16.msra.mxu1 %v1650_v58 }
 0x17b   : > { %v3490_v16 = vpop.f32.mrb[0].mxu0 }
 0x17c   : > { %v1003_v17 = vpop.f32.mrb[1].mxu0 }
 0x17d   : > { %v1004_v18 = vadd.f32 %v3278_v15, %v1003_v17  ;;  %v3491_v20 = vpop.f32.mrb[2].mxu0 }
 0x17e   : > { %v1006_v21 = vpop.f32.mrb[3].mxu0 }
 0x17f   : > { %v1066_v22 = vmax.f32 %v1004_v18, 0.0 }
 0x181   : > { %v1082_v23 = vsel %vm877_vm3, %v1066_v22, 0.0 }
 0x182   : > { %1083 = vadd.xlane.f32.xlu0 %v1082_v23 }
 0x20f   : > { %v1084_v24 = vpop.xlane.xlu0 %1083 }
 0x210   : > { %v1131_v25 = vmul.f32 0.03125, %v1084_v24 }
 0x212   : > { %v1147_v26 = vsub.f32 %v1066_v22, %v1131_v25 }
 0x214   : > { %v1163_v27 = vmul.f32 %v1147_v26, %v1147_v26 }
 0x216   : > { %v1179_v28 = vsel %vm877_vm3, %v1163_v27, 0.0 }
 0x217   : > { %1180 = vadd.xlane.f32.xlu1 %v1179_v28 }
 0x228   : > { %4092 = vrot.lane.b32.xlu1 %v4368_v29, %s4366_s25 }
 0x22c   : > { %4107 = vrot.lane.b32.xlu1 %v4666_v31, %s4367_s19 }
 0x230   : > { %4117 = vrot.lane.b32.xlu1 %v4116_v42, %s4366_s25 }
 0x2a4   : > { %v1181_v47 = vpop.xlane.xlu1 %1180 }
 0x2a5   : > { %v1227_v48 = vmul.f32 0.03125, %v1181_v47  ;;  %v4761_v47 = vld [vmem:[%s4531_s23 + $0x40] sm:$0xff] }
 0x2a7   : > { %v1243_v49 = vadd.f32 1e-05, %v1227_v48  ;;  %v4764_v48 = vld [vmem:[%s4531_s23 + $0x48] sm:$0xff] }
 0x2a8   : > { %v4093_v5 = vpop.permute.xlu1 %4092  ;;  %v645_v52 = vrot.slane %v4764_v48, 1 }
 0x2a9   : > { %4232 = vrsqrt.f32 %v1243_v49  ;;  %v4095_v13 = vunpack.i.h.bf16 %v4093_v5  ;;  %v4094_v14 = vunpack.i.l.bf16 %v4093_v5  ;;  %v644_v49 = vrot.slane %v4761_v47, 1 }
 0x2ab   : > { %v1596_v22 = vsel %vm877_vm3, %v4726_v6, %v4095_v13  ;;  %v1595_v23 = vsel %vm877_vm3, %v4726_v6, %v4094_v14  ;;  %v660_v53 = vsel %vm652_vm0, %v643_v41, %v644_v49 }
 0x2ac   : > { %v4108_v9 = vpop.permute.xlu1 %4107  ;;  %v4126_v54 = vpack.i.bf16 %v660_v53, %v661_v50 }
 0x2ad   : > { %v4110_v16 = vunpack.i.h.bf16 %v4108_v9  ;;  %v4109_v20 = vunpack.i.l.bf16 %v4108_v9 }
 0x2ae   : > { %4127 = vrot.lane.b32.xlu1 %v4126_v54, %s4367_s19 }
 0x2af   : > { %v1611_v32 = vsel %vm894_vm4, %v1595_v23, %v4109_v20  ;;  %v1612_v33 = vsel %vm894_vm4, %v1596_v22, %v4110_v16 }
 0x2b0   : > { %v1626_v39 = vpack.c.bf16 %v1612_v33, %v1611_v32  ;;  %v4131_v33 = vpack.i.bf16 %v4764_v48, %v4761_v47 }
 0x2b3   : > { %v4233_v56 = vpop.eup %4232 }
 0x2b4   : > { %v1275_v59 = vmul.f32 %v4233_v56, %v1147_v26  ;;  %v4776_v56 = vld [vmem:[%s4531_s23 + $0x58] sm:$0xff] }
 0x2b5   : > { %v4136_v58 = vpack.i.bf16 %v4776_v56, %v4773_v55  ;;  %v517_v42 = vrot.slane %v4776_v56, 7 }
 0x2b6   : > { %v1298_v61 = vmul.f32 %v3287_v57, %v1275_v59  ;;  %v647_v57 = vrot.slane %v4776_v56, 1  ;;  %v646_v59 = vrot.slane %v4773_v55, 1 }
 0x2b7   : > { %4137 = vrot.lane.b32.xlu1 %v4136_v58, %s4366_s25 }
 0x2b8   : > { %v4712_v62 = vadd.f32 %v3288_v60, %v1298_v61  ;;  %v659_v60 = vsel %vm652_vm0, %v644_v49, %v645_v52  ;;  %v658_v61 = vsel %vm652_vm0, %v645_v52, %v646_v59  ;;  %v657_v5 = vsel %vm652_vm0, %v646_v59, %v647_v57 }
 0x2ba   : > { %v4096_v63 = vpack.i.bf16 %v4368_v29, %v4712_v62  ;;  %v1417_v0 = vrot.slane %v4712_v62, 1  ;;  %v1369_v10 = vrot.slane %v4712_v62, 7 }
 0x2bc   : > { %4097 = vrot.lane.b32.xlu0 %v4096_v63, %s4366_s25  ;;  %v1447_v2 = vsel %vm652_vm0, %v1417_v0, %v4662_v30  ;;  %v1400_v21 = vsel %vm524_vm1, %v4726_v6, %v1369_v10  ;;  %v1399_v27 = vsel %vm524_vm1, %v1369_v10, %v4726_v6  ;;  %v4788_v63 = vld [vmem:[%s4531_s23 + $0x60] sm:$0xff]  ;;  %v4797_v10 = vld [vmem:[%s4531_s23 + $0x70] sm:$0xff] }
 0x2bd   : > { %v4101_v3 = vpack.i.bf16 %v4662_v30, %v1447_v2  ;;  %v1401_v28 = vsel %vm572_vm2, %v1400_v21, 0.0  ;;  %v4141_v2 = vpack.i.bf16 %v658_v61, %v659_v60  ;;  %v4156_v14 = vpack.i.bf16 %v4625_v44, %v4797_v10 }
 0x2c0   : > { %4102 = vrot.lane.b32.xlu0 %v4101_v3, %s4367_s19  ;;  %v648_v3 = vrot.slane %v4788_v63, 1 }
 0x2c2   : > { %v656_v9 = vsel %vm652_vm0, %v647_v57, %v648_v3  ;;  %v4118_v57 = vpop.permute.xlu1 %4117 }
 0x2c3   : > { %v4146_v13 = vpack.i.bf16 %v656_v9, %v657_v5  ;;  %v4120_v58 = vunpack.i.h.bf16 %v4118_v57  ;;  %v4119_v59 = vunpack.i.l.bf16 %v4118_v57 }
 0x2c5   : > { %4147 = vrot.lane.b32.xlu1 %v4146_v13, %s4367_s19 }
 0x2c9   : > { %4157 = vrot.lane.b32.xlu1 %v4156_v14, %s4366_s25 }
 0x320   : > { %v4128_v9 = vpop.permute.xlu1 %4127 }
 0x321   : > { %v4130_v13 = vunpack.i.h.bf16 %v4128_v9  ;;  %v4129_v14 = vunpack.i.l.bf16 %v4128_v9 }
 0x32e   : > { %v4098_v15 = vpop.permute.xlu0 %4097 }
 0x32f   : > { %v4100_v17 = vunpack.i.h.bf16 %v4098_v15  ;;  %v4099_v18 = vunpack.i.l.bf16 %v4098_v15  ;;  %v3289_v15 = vld [vmem:[%s5557_s6] ss:$0 sm:$0xff] }
 0x331   : > { %v1593_v34 = vsel %vm877_vm3, %v1401_v28, %v4099_v18  ;;  %v1594_v35 = vsel %vm877_vm3, %v1399_v27, %v4100_v17 }
 0x332   : > { %v4103_v24 = vpop.permute.xlu0 %4102 }
 0x333   : > { %v4105_v25 = vunpack.i.h.bf16 %v4103_v24  ;;  %v4104_v26 = vunpack.i.l.bf16 %v4103_v24  ;;  %v495_v24 = vld [vmem:[%s4531_s23 + $0x28] sm:$0xff] }
 0x335   : > { %v1609_v36 = vsel %vm894_vm4, %v1593_v34, %v4104_v26  ;;  %v1610_v37 = vsel %vm894_vm4, %v1594_v35, %v4105_v25  ;;  %v641_v25 = vrot.slane %v495_v24, 1  ;;  %v4111_v26 = vpack.i.bf16 %v495_v24, %v4553_v8  ;;  %v4823_v34 = vld [vmem:[%s4531_s23 + $0x68] sm:$0xff] }
 0x336   : > { %v1625_v38 = vpack.c.bf16 %v1610_v37, %v1609_v36  ;;  %v650_v35 = vrot.slane %v4797_v10, 1  ;;  %v649_v36 = vrot.slane %v4823_v34, 1  ;;  %v511_v37 = vrot.slane %v495_v24, 7 }
 0x337   : > { %v662_v27 = vsel %vm652_vm0, %v641_v25, %v642_v43  ;;  %v663_v28 = vsel %vm652_vm0, %v640_v19, %v641_v25  ;;  %v512_v19 = vrot.slane %v4750_v46, 7  ;;  %v4151_v41 = vpack.i.bf16 %v4823_v34, %v4788_v63 }
 0x338   : > { %3516 = vmatprep.mubr.msk.bf16.mxu1 %vm944_vm5, %v1625_v38  ;;  %v4121_v32 = vpack.i.bf16 %v662_v27, %v663_v28  ;;  %v513_v38 = vrot.slane %v4753_v40, 7  ;;  %v516_v43 = vrot.slane %v4773_v55, 7  ;;  %v654_v49 = vsel %vm652_vm0, %v649_v36, %v650_v35 }
 0x339   : > { %3517 = vmatmul.mubr.msk.bf16.vlgmr.msra.gmra.mrb[0].mxu1 %vm944_vm5, %v1626_v39  ;;  %v515_v39 = vrot.slane %v4764_v48, 7  ;;  %v655_v50 = vsel %vm652_vm0, %v648_v3, %v649_v36  ;;  %v520_v46 = vrot.slane %v4797_v10, 7  ;;  %v519_v52 = vrot.slane %v4823_v34, 7  ;;  %v3298_v10 = vld [vmem:[%s5558_s7] ss:$0 sm:$0xff] }
 0x33a   : > { %v4161_v53 = vpack.i.bf16 %v654_v49, %v655_v50  ;;  %v533_v54 = vsel %vm524_vm1, %v512_v19, %v513_v38  ;;  %v534_v55 = vsel %vm524_vm1, %v511_v37, %v512_v19  ;;  %v529_v60 = vsel %vm524_vm1, %v516_v43, %v517_v42 }
 0x33b   : > { %v530_v61 = vsel %vm524_vm1, %v515_v39, %v516_v43  ;;  %v885_v3 = vsel %vm877_vm3, %v533_v54, %v4120_v58  ;;  %v884_v5 = vsel %vm877_vm3, %v534_v55, %v4119_v59  ;;  %v510_v19 = vrot.slane %v4553_v8, 7 }
 0x33c   : > { %v555_v8 = vadd.s32 120, %v4560_v12  ;;  %v653_v48 = vsel %vm652_vm0, %v650_v35, %v651_v7 }
 0x33d   : > { %v535_v49 = vsel %vm524_vm1, %v510_v19, %v511_v37  ;;  %v536_v54 = vsel %vm524_vm1, %v509_v51, %v510_v19 }
 0x33e   : > { %v4895_v9 = vadd.s32 1, %v555_v8  ;;  %v525_v8 = vsel %vm524_vm1, %v520_v46, %v521_v45 }
 0x340   : > { %vm716_vm6 = vcmp.lt.s32.totalorder %v4895_v9, 128 }
 0x40c   : > { %v3518_v16 = vpop.f32.mrb[0].mxu1 }
 0x40d   : > { %v1716_v17 = vpop.f32.mrb[1].mxu1  ;;  %v902_v16 = vsel %vm894_vm4, %v885_v3, %v4130_v13  ;;  %v514_v3 = vrot.slane %v4761_v47, 7 }
 0x40e   : > { %v4806_v18 = vadd.f32 %v3289_v15, %v1716_v17  ;;  %v3519_v20 = vpop.f32.mrb[2].mxu1  ;;  %v901_v15 = vsel %vm894_vm4, %v884_v5, %v4129_v14 }
 0x40f   : > { %v1719_v21 = vpop.f32.mrb[3].mxu1  ;;  %v914_v17 = vpack.c.bf16 %v902_v16, %v901_v15  ;;  %v531_v15 = vsel %vm524_vm1, %v514_v3, %v515_v39  ;;  %v532_v47 = vsel %vm524_vm1, %v513_v38, %v514_v3 }
 0x410   : > { %v1779_v22 = vmax.f32 %v4806_v18, 0.0  ;;  %v4138_v18 = vpop.permute.xlu1 %4137 }
 0x411   : > { %v4140_v20 = vunpack.i.h.bf16 %v4138_v18  ;;  %v4139_v21 = vunpack.i.l.bf16 %v4138_v18 }
 0x412   : > { %v1795_v23 = vsel %vm877_vm3, %v1779_v22, 0.0 }
 0x413   : > { %1796 = vadd.xlane.f32.xlu0 %v1795_v23  ;;  %v889_v23 = vsel %vm877_vm3, %v529_v60, %v4140_v20  ;;  %v888_v24 = vsel %vm877_vm3, %v530_v61, %v4139_v21  ;;  %v668_v20 = vsel %vm652_vm0, %v651_v7, %v636_v11 }
 0x414   : > { %v4148_v25 = vpop.permute.xlu1 %4147  ;;  %v748_v1 = vsel %vm716_vm6, %v668_v20, 0.0 }
 0x415   : > { %v4149_v27 = vunpack.i.l.bf16 %v4148_v25 }
 0x417   : > { %v905_v28 = vsel %vm894_vm4, %v888_v24, %v4149_v27 }
 0x429   : > { %4112 = vrot.lane.b32.xlu0 %v4111_v26, %s4366_s25  ;;  %v4150_v26 = vunpack.i.h.bf16 %v4148_v25  ;;  %v4166_v25 = vpack.i.bf16 %v748_v1, %v653_v48 }
 0x42d   : > { %4122 = vrot.lane.b32.xlu0 %v4121_v32, %s4367_s19  ;;  %v906_v32 = vsel %vm894_vm4, %v889_v23, %v4150_v26  ;;  %v518_v23 = vrot.slane %v4788_v63, 7 }
 0x42f   : > { %v527_v27 = vsel %vm524_vm1, %v518_v23, %v519_v52 }
 0x431   : > { %4132 = vrot.lane.b32.xlu0 %v4131_v33, %s4366_s25  ;;  %v916_v33 = vpack.c.bf16 %v906_v32, %v905_v28  ;;  %v528_v28 = vsel %vm524_vm1, %v517_v42, %v518_v23 }
 0x435   : > { %4142 = vrot.lane.b32.xlu0 %v4141_v2, %s4367_s19  ;;  %v4865_v2 = vsel %vm524_vm1, %v519_v52, %v520_v46 }
 0x439   : > { %4152 = vrot.lane.b32.xlu0 %v4151_v41, %s4366_s25 }
 0x43d   : > { %4162 = vrot.lane.b32.xlu0 %v4161_v53, %s4367_s19 }
 0x4a0   : > { %v1797_v36 = vpop.xlane.xlu0 %1796 }
 0x4a1   : > { %v1843_v41 = vmul.f32 0.03125, %v1797_v36 }
 0x4a3   : > { %v4877_v43 = vsub.f32 %v1779_v22, %v1843_v41 }
 0x4a4   : > { %v4113_v50 = vpop.permute.xlu0 %4112 }
 0x4a5   : > { %v1875_v53 = vmul.f32 %v4877_v43, %v4877_v43  ;;  %v4115_v55 = vunpack.i.h.bf16 %v4113_v50  ;;  %v4114_v57 = vunpack.i.l.bf16 %v4113_v50  ;;  %v2066_v50 = vld [vmem:[#allocation4] sm:$0x1] }
 0x4a7   : > { %v1891_v58 = vsel %vm877_vm3, %v1875_v53, 0.0  ;;  %v883_v22 = vsel %vm877_vm3, %v535_v49, %v4115_v55  ;;  %v882_v37 = vsel %vm877_vm3, %v536_v54, %v4114_v57  ;;  %v4369_v53 = vmov 0  }
 0x4a8   : > { %1892 = vadd.xlane.f32.xlu1 %v1891_v58  ;;  %v4123_v59 = vpop.permute.xlu0 %4122  ;;  %4171 = vset.pattern.permute.xlu0 %v4369_v53 }
 0x4a9   : > { %v4125_v60 = vunpack.i.h.bf16 %v4123_v59  ;;  %v4124_v61 = vunpack.i.l.bf16 %v4123_v59  ;;  %2069 = vperm.xlu0 %4171, %v2066_v50  }
 0x4ab   : > { %v899_v51 = vsel %vm894_vm4, %v882_v37, %v4124_v61  ;;  %v900_v5 = vsel %vm894_vm4, %v883_v22, %v4125_v60 }
 0x4ac   : > { %v913_v13 = vpack.c.bf16 %v900_v5, %v899_v51  ;;  %v4133_v14 = vpop.permute.xlu0 %4132 }
 0x4ad   : > { %v4135_v16 = vunpack.i.h.bf16 %v4133_v14  ;;  %v4134_v18 = vunpack.i.l.bf16 %v4133_v14  ;;  %v2065_v14 = vld [vmem:[%s5560_s9] sm:$0x1] }
 0x4ae   : > { %3492 = vmatprep.mubr.msk.bf16.mxu0 %vm944_vm5, %v913_v13 }
 0x4af   : > { %3493 = vmatmul.mubr.msk.bf16.gmra.mrb[4].mxu0 %vm944_vm5, %v914_v17  ;;  %v887_v40 = vsel %vm877_vm3, %v531_v15, %v4135_v16  ;;  %v886_v38 = vsel %vm877_vm3, %v532_v47, %v4134_v18 }
 0x4b0   : > { %v4143_v39 = vpop.permute.xlu0 %4142 }
 0x4b1   : > { %v4145_v11 = vunpack.i.h.bf16 %v4143_v39  ;;  %v4144_v21 = vunpack.i.l.bf16 %v4143_v39 }
 0x4b3   : > { %v903_v17 = vsel %vm894_vm4, %v886_v38, %v4144_v21  ;;  %v904_v24 = vsel %vm894_vm4, %v887_v40, %v4145_v11  ;;  %v2074_v21 = vsub.s32 0, %v4560_v12 }
 0x4b4   : > { %v915_v35 = vpack.c.bf16 %v904_v24, %v903_v17  ;;  %v4153_v26 = vpop.permute.xlu0 %4152 }
 0x4b5   : > { %v4155_v32 = vunpack.i.h.bf16 %v4153_v26  ;;  %v4154_v36 = vunpack.i.l.bf16 %v4153_v26 }
 0x4b6   : > { %3496 = vmatprep.mubr.msk.bf16.mxu0 %vm944_vm5, %v915_v35 }
 0x4b7   : > { %3497 = vmatmul.mubr.msk.bf16.gmra.mrb[8].mxu0 %vm944_vm5, %v916_v33  ;;  %v891_v63 = vsel %vm877_vm3, %v527_v27, %v4155_v32  ;;  %v890_v19 = vsel %vm877_vm3, %v528_v28, %v4154_v36  ;;  %v4158_v33 = vpop.permute.xlu1 %4157  ;;  %v4966_v27 = vand.u32 127, %v522_v4 }
 0x4b8   : > { %v4163_v41 = vpop.permute.xlu0 %4162  ;;  %v4160_v57 = vunpack.i.h.bf16 %v4158_v33  ;;  %v4159_v58 = vunpack.i.l.bf16 %v4158_v33 }
 0x4b9   : > { %4167 = vrot.lane.b32.xlu1 %v4166_v25, %s4367_s19  ;;  %v4165_v34 = vunpack.i.h.bf16 %v4163_v41  ;;  %v4164_v52 = vunpack.i.l.bf16 %v4163_v41  ;;  %vm2199_vm8 = vcmp.lt.s32.totalorder %v4966_v27, 8  ;;  %vm2217_vm12 = vcmp.ge.s32.totalorder %v4966_v27, 1 }
 0x4ba   : > { %v893_v61 = vsel %vm877_vm3, %v525_v8, %v4160_v57  ;;  %v892_v3 = vsel %vm877_vm3, %v4865_v2, %v4159_v58  ;;  %v3299_v2 = vld [vmem:[%s5559_s8] ss:$0 sm:$0xff]  ;;  %vm2222_vm13 = vcmp.ge.s32.totalorder %v4966_v27, 2  ;;  %vm2227_vm14 = vcmp.ge.s32.totalorder %v4966_v27, 4 }
 0x4bb   : > { %v907_v56 = vsel %vm894_vm4, %v890_v19, %v4164_v52  ;;  %v908_v49 = vsel %vm894_vm4, %v891_v63, %v4165_v34  ;;  %vm2232_vm15 = vcmp.ge.s32.totalorder %v4966_v27, 8  ;;  %vm2242_vm1 = vcmp.ge.s32.totalorder %v4966_v27, 32 }
 0x4bc   : > { %v917_v42 = vpack.c.bf16 %v908_v49, %v907_v56  ;;  %vm2247_vm2 = vcmp.ge.s32.totalorder %v4966_v27, 64 }
 0x4be   : > { %3500 = vmatprep.mubr.msk.bf16.mxu0 %vm944_vm5, %v917_v42 }
 0x528   : > { %v2070_v23 = vpop.permute.xlu0 %2069 }
 0x529   : > { %v2075_v17 = vrot.slane %v2070_v23, %v2074_v21 }
 0x535   : > { %v1893_v54 = vpop.xlane.xlu1 %1892 }
 0x536   : > { %v1939_v55 = vmul.f32 0.03125, %v1893_v54 }
 0x538   : > { %v1955_v22 = vadd.f32 1e-05, %v1939_v55 }
 0x539   : > { %v4168_v37 = vpop.permute.xlu1 %4167 }
 0x53a   : > { %4234 = vrsqrt.f32 %v1955_v22  ;;  %v4170_v59 = vunpack.i.h.bf16 %v4168_v37  ;;  %v4169_v60 = vunpack.i.l.bf16 %v4168_v37 }
 0x53c   : > { %v910_v7 = vsel %vm894_vm4, %v893_v61, %v4170_v59  ;;  %v909_v51 = vsel %vm894_vm4, %v892_v3, %v4169_v60 }
 0x53d   : > { %v918_v44 = vpack.c.bf16 %v910_v7, %v909_v51 }
 0x53f   : > { %3501 = vmatmul.mubr.msk.bf16.gmra.mrb[12].mxu0 %vm944_vm5, %v918_v44 }
 0x540   : > { %3534 = vmatprep.mubr.msk.f32.mxu0 %vm4370_vm7, %v4368_v29 }
 0x544   : > { %v4235_v45 = vpop.eup %4234 }
 0x545   : > { %v1987_v46 = vmul.f32 %v4235_v45, %v4877_v43 }
 0x547   : > { %v2010_v5 = vmul.f32 %v3298_v10, %v1987_v46 }
 0x549   : > { %v2033_v13 = vadd.f32 %v3299_v2, %v2010_v5  ;;  %v1448_v2 = vsel %vm652_vm0, %v4662_v30, %v1417_v0  ;;  %vm2237_vm0 = vcmp.ge.s32.totalorder %v4966_v27, 16 }
 0x54a   : > { %v1464_v5 = vsel %vm716_vm6, %v1448_v2, 0.0 }
 0x54b   : > { %3533 = vmatpush3.xpose.msk.msra.mxu0 %vm877_vm3, %v2033_v13  ;;  %v4227_v13 = vpack.i.bf16 %v1464_v5, %v4662_v30 }
 0x54e   : > { %3535 = vmatmul.mubr.msk.f32.vlgmr.msra.gmra.mrb[16].mxu0 %vm877_vm3, %v2065_v14 }
 0x582   : > { %v3494_v15 = vpop.f32.mrb[4].mxu0 }
 0x583   : > { %v1019_v47 = vpop.f32.mrb[5].mxu0 }
 0x584   : > { %v3495_v16 = vpop.f32.mrb[6].mxu0 }
 0x585   : > { %v1022_v18 = vpop.f32.mrb[7].mxu0 }
 0x58a   : > { %v3498_v20 = vpop.f32.mrb[8].mxu0 }
 0x58b   : > { %v1035_v43 = vpop.f32.mrb[9].mxu0 }
 0x58c   : > { %v3499_v48 = vpop.f32.mrb[10].mxu0 }
 0x58d   : > { %v1038_v40 = vpop.f32.mrb[11].mxu0 }
 0x612   : > { %v3502_v38 = vpop.f32.mrb[12].mxu0 }
 0x613   : > { %v1051_v39 = vpop.f32.mrb[13].mxu0 }
 0x614   : > { %v3503_v1 = vpop.f32.mrb[14].mxu0 }
 0x615   : > { %v1054_v11 = vpop.f32.mrb[15].mxu0 }
 0x621   : > { %v2193_v24 = vpop.f32.mrb[16].mxu0 }
 0x622   : > { %v2194_v25 = vadd.f32 %v2193_v24, %v2075_v17  ;;  %v3536_v35 = vpop.f32.mrb[17].mxu0 }
 0x624   : > { %v2200_v26 = vmul.f32 1.442695, %v2194_v25 }
 0x626   : > { %4236 = vpow2.f32 %v2200_v26 }
 0x630   : > { %v4237_v28 = vpop.eup %4236 }
 0x631   : > { %v2202_v32 = vsel %vm2199_vm8, %v4237_v28, 0.0 }
 0x632   : > { %v2203_v36 = vfloor.f32 %v2202_v32  ;;  %2214 = vst [vmem:[%s5586_s27] sm:$0x1] %v2202_v32  ;;  %v2204_v19 = vadd.f32 0.5, %v2202_v32 }
 0x634   : > { %v2208_v63 = vmul.f32 0.5, %v2203_v36  ;;  %v2206_v41 = vsub.f32 %v2202_v32, %v2203_v36  ;;  %v2205_v56 = vfloor.f32 %v2204_v19 }
 0x636   : > { %v2209_v34 = vfloor.f32 %v2208_v63  ;;  %vm2207_vm9 = vcmp.eq.f32.partialorder %v2206_v41, 0.5 }
 0x638   : > { %v2210_v52 = vmul.f32 2.0, %v2209_v34 }
 0x63a   : > { %vm2211_vm10 = vcmp.eq.f32.partialorder %v2210_v52, %v2203_v36 }
 0x63b   : > { %vm2212_vm11 = vmand %vm2207_vm9, %vm2211_vm10 }
 0x63c   : > { %v2213_v49 = vsel %vm2212_vm11, %v2203_v36, %v2205_v56 }
 0x63d   : > { %2218 = vrot.lane.b32.xlu1 %v2213_v49, %s4371_s10  ;;  %v3977_v4 = vtrunc.f32 %v2213_v49 }
 0x63f   : > { %v3978_v42 = vcvt.f32.s32 %v3977_v4 }
 0x641   : > { %2216 = vst [vmem:[%s5587_s24] sm:$0x1] %v3978_v42 }
 0x6af   : > { %v2219_v50 = vpop.permute.xlu1 %2218 }
 0x6b0   : > { %v2220_v53 = vsel %vm2217_vm12, %v2219_v50, 0.0 }
 0x6b1   : > { %v2221_v33 = vadd.f32 %v2220_v53, %v2213_v49 }
 0x6b3   : > { %2223 = vrot.lane.b32.xlu1 %v2221_v33, %s4372_s29 }
 0x725   : > { %v2224_v54 = vpop.permute.xlu1 %2223 }
 0x726   : > { %v2225_v55 = vsel %vm2222_vm13, %v2224_v54, 0.0 }
 0x727   : > { %v2226_v57 = vadd.f32 %v2225_v55, %v2221_v33 }
 0x729   : > { %2228 = vrot.lane.b32.xlu0 %v2226_v57, %s4373_s15 }
 0x72d   : > { %4173 = vrot.lane.b32.xlu0 %v4368_v29, %s4366_s25 }
 0x731   : > { %4183 = vrot.lane.b32.xlu0 %v4666_v31, %s4367_s19 }
 0x735   : > { %4193 = vrot.lane.b32.xlu0 %v4368_v29, %s4366_s25 }
 0x739   : > { %4203 = vrot.lane.b32.xlu0 %v4666_v31, %s4367_s19 }
 0x73d   : > { %4213 = vrot.lane.b32.xlu0 %v4368_v29, %s4366_s25 }
 0x741   : > { %4223 = vrot.lane.b32.xlu0 %v4666_v31, %s4367_s19 }
 0x79b   : > { %v2229_v58 = vpop.permute.xlu0 %2228 }
 0x79c   : > { %v2230_v8 = vsel %vm2227_vm14, %v2229_v58, 0.0 }
 0x79d   : > { %v2231_v22 = vadd.f32 %v2230_v8, %v2226_v57 }
 0x79f   : > { %2233 = vrot.lane.b32.xlu1 %v2231_v22, %s4374_s16  ;;  %v4174_v37 = vpop.permute.xlu0 %4173 }
 0x7a0   : > { %v4176_v59 = vunpack.i.h.bf16 %v4174_v37  ;;  %v4175_v60 = vunpack.i.l.bf16 %v4174_v37 }
 0x7a2   : > { %v1598_v61 = vsel %vm877_vm3, %v4726_v6, %v4176_v59  ;;  %v1597_v3 = vsel %vm877_vm3, %v4726_v6, %v4175_v60 }
 0x7a3   : > { %4178 = vrot.lane.b32.xlu1 %v4368_v29, %s4366_s25  ;;  %v4184_v7 = vpop.permute.xlu0 %4183 }
 0x7a4   : > { %v4186_v51 = vunpack.i.h.bf16 %v4184_v7  ;;  %v4185_v44 = vunpack.i.l.bf16 %v4184_v7 }
 0x7a6   : > { %v1613_v45 = vsel %vm894_vm4, %v1597_v3, %v4185_v44  ;;  %v1614_v10 = vsel %vm894_vm4, %v1598_v61, %v4186_v51 }
 0x7a7   : > { %4188 = vrot.lane.b32.xlu1 %v4666_v31, %s4367_s19  ;;  %v1627_v46 = vpack.c.bf16 %v1614_v10, %v1613_v45  ;;  %v4194_v14 = vpop.permute.xlu0 %4193 }
 0x7a8   : > { %v4196_v47 = vunpack.i.h.bf16 %v4194_v14  ;;  %v4195_v16 = vunpack.i.l.bf16 %v4194_v14 }
 0x7a9   : > { %3520 = vmatprep.mubr.msk.bf16.mxu1 %vm944_vm5, %v1627_v46 }
 0x7aa   : > { %v1602_v30 = vsel %vm877_vm3, %v4726_v6, %v4196_v47  ;;  %v1601_v48 = vsel %vm877_vm3, %v4726_v6, %v4195_v16 }
 0x7ab   : > { %4198 = vrot.lane.b32.xlu1 %v4368_v29, %s4366_s25  ;;  %v4204_v15 = vpop.permute.xlu0 %4203 }
 0x7ac   : > { %v4206_v18 = vunpack.i.h.bf16 %v4204_v15  ;;  %v4205_v20 = vunpack.i.l.bf16 %v4204_v15 }
 0x7ae   : > { %v1617_v1 = vsel %vm894_vm4, %v1601_v48, %v4205_v20  ;;  %v1618_v11 = vsel %vm894_vm4, %v1602_v30, %v4206_v18 }
 0x7af   : > { %4208 = vrot.lane.b32.xlu1 %v4666_v31, %s4367_s19  ;;  %v4214_v0 = vpop.permute.xlu0 %4213  ;;  %v1629_v28 = vpack.c.bf16 %v1618_v11, %v1617_v1 }
 0x7b0   : > { %v4216_v17 = vunpack.i.h.bf16 %v4214_v0  ;;  %v4215_v24 = vunpack.i.l.bf16 %v4214_v0 }
 0x7b2   : > { %v1606_v52 = vsel %vm877_vm3, %v4726_v6, %v4216_v17  ;;  %v1605_v56 = vsel %vm877_vm3, %v4726_v6, %v4215_v24 }
 0x7b3   : > { %4218 = vrot.lane.b32.xlu1 %v4368_v29, %s4366_s25  ;;  %v4224_v25 = vpop.permute.xlu0 %4223 }
 0x7b4   : > { %v4226_v63 = vunpack.i.h.bf16 %v4224_v25  ;;  %v4225_v19 = vunpack.i.l.bf16 %v4224_v25 }
 0x7b6   : > { %v1621_v50 = vsel %vm894_vm4, %v1605_v56, %v4225_v19  ;;  %v1622_v53 = vsel %vm894_vm4, %v1606_v52, %v4226_v63 }
 0x7b7   : > { %4228 = vrot.lane.b32.xlu1 %v4227_v13, %s4367_s19  ;;  %v1631_v58 = vpack.c.bf16 %v1622_v53, %v1621_v50 }
 0x811   : > { %v2234_v31 = vpop.permute.xlu1 %2233 }
 0x812   : > { %v2235_v62 = vsel %vm2232_vm15, %v2234_v31, 0.0 }
 0x813   : > { %v2236_v12 = vadd.f32 %v2235_v62, %v2231_v22 }
 0x815   : > { %2238 = vrot.lane.b32.xlu0 %v2236_v12, %s4375_s20  ;;  %v4179_v9 = vpop.permute.xlu1 %4178 }
 0x816   : > { %v4181_v29 = vunpack.i.h.bf16 %v4179_v9  ;;  %v4180_v43 = vunpack.i.l.bf16 %v4179_v9 }
 0x818   : > { %v1600_v40 = vsel %vm877_vm3, %v4726_v6, %v4181_v29  ;;  %v1599_v38 = vsel %vm877_vm3, %v4726_v6, %v4180_v43 }
 0x819   : > { %v4189_v39 = vpop.permute.xlu1 %4188 }
 0x81a   : > { %v4191_v21 = vunpack.i.h.bf16 %v4189_v39  ;;  %v4190_v23 = vunpack.i.l.bf16 %v4189_v39 }
 0x81c   : > { %v1615_v35 = vsel %vm894_vm4, %v1599_v38, %v4190_v23  ;;  %v1616_v26 = vsel %vm894_vm4, %v1600_v40, %v4191_v21 }
 0x81d   : > { %v1628_v32 = vpack.c.bf16 %v1616_v26, %v1615_v35  ;;  %v4199_v36 = vpop.permute.xlu1 %4198 }
 0x81e   : > { %v4201_v41 = vunpack.i.h.bf16 %v4199_v36  ;;  %v4200_v34 = vunpack.i.l.bf16 %v4199_v36 }
 0x81f   : > { %3521 = vmatmul.mubr.msk.bf16.gmra.mrb[4].mxu1 %vm944_vm5, %v1628_v32 }
 0x820   : > { %3524 = vmatprep.mubr.msk.bf16.mxu1 %vm944_vm5, %v1629_v28  ;;  %v1604_v49 = vsel %vm877_vm3, %v4726_v6, %v4201_v41  ;;  %v1603_v4 = vsel %vm877_vm3, %v4726_v6, %v4200_v34 }
 0x821   : > { %v4209_v42 = vpop.permute.xlu1 %4208 }
 0x822   : > { %v4211_v33 = vunpack.i.h.bf16 %v4209_v42  ;;  %v4210_v54 = vunpack.i.l.bf16 %v4209_v42 }
 0x824   : > { %v1619_v55 = vsel %vm894_vm4, %v1603_v4, %v4210_v54  ;;  %v1620_v57 = vsel %vm894_vm4, %v1604_v49, %v4211_v33 }
 0x825   : > { %v1630_v8 = vpack.c.bf16 %v1620_v57, %v1619_v55  ;;  %v4219_v22 = vpop.permute.xlu1 %4218 }
 0x826   : > { %v4221_v37 = vunpack.i.h.bf16 %v4219_v22  ;;  %v4220_v59 = vunpack.i.l.bf16 %v4219_v22 }
 0x827   : > { %3525 = vmatmul.mubr.msk.bf16.gmra.mrb[8].mxu1 %vm944_vm5, %v1630_v8 }
 0x828   : > { %3528 = vmatprep.mubr.msk.bf16.mxu1 %vm944_vm5, %v1631_v58  ;;  %v1608_v60 = vsel %vm877_vm3, %v4726_v6, %v4221_v37  ;;  %v1607_v61 = vsel %vm877_vm3, %v4726_v6, %v4220_v59 }
 0x829   : > { %v4229_v3 = vpop.permute.xlu1 %4228 }
 0x82a   : > { %v4231_v7 = vunpack.i.h.bf16 %v4229_v3  ;;  %v4230_v51 = vunpack.i.l.bf16 %v4229_v3 }
 0x82c   : > { %v1623_v44 = vsel %vm894_vm4, %v1607_v61, %v4230_v51  ;;  %v1624_v45 = vsel %vm894_vm4, %v1608_v60, %v4231_v7 }
 0x82d   : > { %v1632_v10 = vpack.c.bf16 %v1624_v45, %v1623_v44 }
 0x82f   : > { %3529 = vmatmul.mubr.msk.bf16.gmra.mrb[12].mxu1 %vm944_vm5, %v1632_v10 }
 0x887   : > { %v2239_v46 = vpop.permute.xlu0 %2238 }
 0x888   : > { %v2240_v2 = vsel %vm2237_vm0, %v2239_v46, 0.0 }
 0x889   : > { %v2241_v5 = vadd.f32 %v2240_v2, %v2236_v12 }
 0x88b   : > { %2243 = vrot.lane.b32.xlu1 %v2241_v5, %s4366_s25 }
 0x8f2   : > { %v3522_v13 = vpop.f32.mrb[4].mxu1 }
 0x8f3   : > { %v1732_v14 = vpop.f32.mrb[5].mxu1 }
 0x8f4   : > { %v3523_v6 = vpop.f32.mrb[6].mxu1 }
 0x8f5   : > { %v1735_v15 = vpop.f32.mrb[7].mxu1 }
 0x8fa   : > { %v3526_v31 = vpop.f32.mrb[8].mxu1 }
 0x8fb   : > { %v1748_v62 = vpop.f32.mrb[9].mxu1 }
 0x8fc   : > { %v3527_v47 = vpop.f32.mrb[10].mxu1 }
 0x8fd   : > { %v2244_v16 = vpop.permute.xlu1 %2243  ;;  %v1751_v0 = vpop.f32.mrb[11].mxu1 }
 0x8fe   : > { %v2245_v9 = vsel %vm2242_vm1, %v2244_v16, 0.0 }
 0x8ff   : > { %v2246_v18 = vadd.f32 %v2245_v9, %v2241_v5 }
 0x901   : > { %2248 = vrot.lane.b32.xlu0 %v2246_v18, %s4367_s19 }
 0x902   : > { %v3530_v20 = vpop.f32.mrb[12].mxu1 }
 0x903   : > { %v1764_v29 = vpop.f32.mrb[13].mxu1 }
 0x904   : > { %v3531_v12 = vpop.f32.mrb[14].mxu1 }
 0x905   : > { %v1767_v43 = vpop.f32.mrb[15].mxu1 }
 0x973   : > { %v2249_v30 = vpop.permute.xlu0 %2248 }
 0x974   : > { %v2250_v48 = vsel %vm2247_vm2, %v2249_v30, 0.0 }
 0x975   : > { %v2251_v40 = vadd.f32 %v2250_v48, %v2246_v18 }
 0x977   : > { %v2255_v38 = vmin.f32 %v2251_v40, 64.0  ;;  %2252 = vrot.lane.b32.xlu1 %v2251_v40, %s4371_s10 }
 0x979   : > { %v3979_v39 = vtrunc.f32 %v2255_v38 }
 0x97b   : > { %v3980_v1 = vcvt.f32.s32 %v3979_v39 }
 0x97d   : > { %2257 = vst [vmem:[#allocation3] sm:$0x1] %v3980_v1 }
 0x9e9   : > { %v2253_v11 = vpop.permute.xlu1 %2252 }
 0x9ea   : > { %v2254_v21 = vsel %vm2217_vm12, %v2253_v11, 0.0 }
 0x9eb   : > { %v2258_v23 = vmin.f32 %v2254_v21, 64.0 }
 0x9ed   : > { %v3981_v17 = vtrunc.f32 %v2258_v23 }
 0x9ef   : > { %v3982_v24 = vcvt.f32.s32 %v3981_v17 }
 0x9f1   : > { %2260 = vst [vmem:[#allocation2] sm:$0x1] %v3982_v24 }
 0x9f2 PF: > { %v2302_v25 = vld [vmem:[%s4531_s23] sm:$0xff]  ;;  %v5063_v35 = vld [vmem:[%s4531_s23 + $0x8] sm:$0xff]  ;;  %v5066_v26 = vld [vmem:[%s4531_s23 + $0x10] sm:$0xff]  ;;  %v2261_v34 = vlaneseq  ;;  %s3302_s25 = sshll.u32 %s4348_s30, 5  ;;  %v4376_v46 = vmov 0.0   ;;  %s3321_s30 = sshll.u32 %s4352_s14, 4 }
 0x9f3   : > { %v2319_v27 = vand.u32 4294901760, %v2302_v25  ;;  %v2322_v28 = vand.u32 4294901760, %v5063_v35  ;;  %v5070_v32 = vld [vmem:[%s4531_s23 + $0x18] sm:$0xff]  ;;  %v2325_v36 = vand.u32 4294901760, %v5066_v26  ;;  %v5074_v63 = vld [vmem:[%s4531_s23 + $0x20] sm:$0xff]  ;;  %v5077_v19 = vld [vmem:[%s4531_s23 + $0x28] sm:$0xff]  ;;  %v5099_v53 = vstv %s3302_s25  ;;  %s5472_s18 = scalar_lea.hbm %s5563_s12, %s3321_s30 }
 0x9f4   : > { %v2328_v41 = vand.u32 4294901760, %v5070_v32  ;;  %v2331_v56 = vand.u32 4294901760, %v5074_v63  ;;  %v2334_v49 = vand.u32 4294901760, %v5077_v19  ;;  %v5092_v42 = vld [vmem:[%s4531_s23 + $0x30] sm:$0xff]  ;;  %v5095_v50 = vld [vmem:[%s4531_s23 + $0x38] sm:$0xff]  ;;  %v5103_v33 = vshrl.u32 %v2261_v34, 7 }
 0x9f5   : > { %v5081_v52 = vpack.c.bf16 %v2322_v28, %v2319_v27  ;;  %v2337_v55 = vand.u32 4294901760, %v5092_v42  ;;  %v2340_v57 = vand.u32 4294901760, %v5095_v50  ;;  %v5117_v8 = vld [vmem:[#allocation3] ss:$0 sm:$0xff]  ;;  %v5123_v37 = vld [vmem:[%s4531_s23 + $0x48] sm:$0xff]  ;;  %v5144_v44 = vld [vmem:[%s4531_s23 + $0x50] sm:$0xff]  ;;  %v5166_v6 = vsub.f32 %v2302_v25, %v2319_v27 }
 0x9f6   : > { %v5089_v4 = vpack.c.bf16 %v2328_v41, %v2325_v36  ;;  %v5111_v54 = vpack.c.bf16 %v2334_v49, %v2331_v56  ;;  %v5120_v22 = vld [vmem:[%s4531_s23 + $0x40] sm:$0xff]  ;;  %v2268_v59 = vadd.s32 %v5099_v53, %v5103_v33  ;;  %v2263_v60 = vadd.s32 8, %v5103_v33  ;;  %v5151_v10 = vld [vmem:[%s4531_s23 + $0x58] sm:$0xff]  ;;  %v5178_v62 = vld [vmem:[%s4531_s23 + $0x68] sm:$0xff]  ;;  %s3103_s27 = scalar_lea.sflag [#allocation6], %s4523_s26  ;;  %s4378_s24 = smov [#allocation5]  }
 0x9f7   : > { %3766 = vmatprep.subr.bf16.mxu1 %v5081_v52  ;;  %3862 = vmatprep.subr.bf16.mxu0 %v5081_v52  ;;  %v5139_v3 = vpack.c.bf16 %v2340_v57, %v2337_v55  ;;  %v2343_v7 = vand.u32 4294901760, %v5120_v22  ;;  %v2346_v51 = vand.u32 4294901760, %v5123_v37  ;;  %v2349_v13 = vand.u32 4294901760, %v5144_v44  ;;  %v5164_v14 = vld [vmem:[%s4531_s23 + $0x60] sm:$0xff]  ;;  %v5213_v48 = vld [vmem:[%s4531_s23 + $0x70] sm:$0xff]  ;;  %v5216_v40 = vld [vmem:[%s4531_s23 + $0x78] sm:$0xff] }
 0x9f8   : > { %3768 = vmatpush3.bf16.msra.mxu1 %v5081_v52  ;;  %3864 = vmatpush3.bf16.msra.mxu0 %v5081_v52  ;;  %v5115_v58 = vld [vmem:[#allocation2] ss:$0 sm:$0xff]  ;;  %vm2286_vm4 = vcmp.lt.s32.totalorder %v2268_v59, %v5117_v8  ;;  %v2269_v61 = vadd.s32 %v5099_v53, %v2263_v60  ;;  %v2352_v31 = vand.u32 4294901760, %v5151_v10  ;;  %v5182_v16 = vsub.f32 %v5063_v35, %v2322_v28  ;;  %s5596_s23 = scalar_lea.vmem [#allocation5], %s4523_s26  ;;  %s4242_s29 = sshll.u32 %s4378_s24, 4  ;;  %s4243_s29 = int_to_ptr.vmem [resolvable:$false] %s4242_s29 }
 0x9f9   : > { %3770 = vmatprep.subr.bf16.mxu1 %v5089_v4  ;;  %3866 = vmatprep.subr.bf16.mxu0 %v5089_v4  ;;  %vm2277_vm3 = vcmp.ge.s32.totalorder %v2268_v59, %v5115_v58  ;;  %v5174_v15 = vpack.c.bf16 %v2346_v51, %v2343_v7  ;;  %v2355_v9 = vand.u32 4294901760, %v5164_v14  ;;  %v2358_v20 = vand.u32 4294901760, %v5178_v62  ;;  %s3123_s19 = sshll.u32 %s5596_s23, 4  ;;  %s4244_s15 = scalar_lea.vmem %s4243_s29, 32  ;;  %s3124_s19 = int_to_ptr.vmem [resolvable:$true] %s3123_s19 }
 0x9fa   : > { %vm5146_vm5 = vmand %vm2277_vm3, %vm2286_vm4  ;;  %vm2278_vm6 = vcmp.ge.s32.totalorder %v2269_v61, %v5115_v58  ;;  %vm2287_vm7 = vcmp.lt.s32.totalorder %v2269_v61, %v5117_v8  ;;  %v2442_v29 = vand.u32 4294901760, %v5166_v6  ;;  %v5202_v43 = vsub.f32 %v5066_v26, %v2325_v36  ;;  %s4238_s10 = scalar_lea.vmem %s3124_s19, 16  ;;  %p4245_p5 = scmp.lt.s32.totalorder %s3124_s19, %s4243_s29 }
 0x9fb   : > { %v3305_v2 = vsel %vm5146_vm5, 1.0, %v4376_v46  ;;  %vm5186_vm8 = vmand %vm2278_vm6, %vm2287_vm7  ;;  %v5210_v30 = vpack.c.bf16 %v2352_v31, %v2349_v13  ;;  %v2449_v39 = vand.u32 4294901760, %v5182_v16  ;;  %v5222_v1 = vsub.f32 %v5070_v32, %v2328_v41  ;;  %p4239_p1 = scmp.ne.s32.totalorder %s3124_s19, %s4238_s10  ;;  %p4246_p6 = scmp.lt.s32.totalorder %s4244_s15, %s4238_s10 }
 0x9fc   : > { %3772 = vmatpush3.bf16.msra.mxu1 %v5089_v4  ;;  %3868 = vmatpush3.bf16.msra.mxu0 %v5089_v4  ;;  %v5157_v5 = vsub.f32 %v3305_v2, %v3305_v2  ;;  %v3306_v12 = vsel %vm5186_vm8, 1.0, %v4376_v46  ;;  %v5229_v21 = vsub.f32 %v5074_v63, %v2331_v56  ;;  %v2361_v23 = vand.u32 4294901760, %v5213_v48 }
 0x9fd   : > { %3774 = vmatprep.subr.bf16.mxu1 %v5111_v54  ;;  %3870 = vmatprep.subr.bf16.mxu0 %v5111_v54  ;;  %v5224_v11 = vsub.f32 %v3306_v12, %v3306_v12  ;;  %v2364_v17 = vand.u32 4294901760, %v5216_v40  ;;  %v2443_v24 = vsub.f32 %v5166_v6, %v2442_v29  ;;  %v2456_v25 = vand.u32 4294901760, %v5202_v43  ;;  %p4240_p2 = pnand %p4239_p1, %p4502_p3  ;;  %p4247_p7 = por %p4246_p6, %p4245_p5 }
 0x9fe   : > { %v2401_v47 = vand.u32 4294901760, %v5157_v5  ;;  %v5243_v35 = vpack.c.bf16 %v2358_v20, %v2355_v9  ;;  %v2450_v26 = vsub.f32 %v5182_v16, %v2449_v39  ;;  %v2463_v27 = vand.u32 4294901760, %v5222_v1 }
 0x9ff   : > { %v5250_v28 = vsub.f32 %v5077_v19, %v2334_v49  ;;  %v5255_v32 = vsub.f32 %v5092_v42, %v2337_v55  ;;  %v2411_v36 = vand.u32 4294901760, %v5224_v11  ;;  %v2470_v63 = vand.u32 4294901760, %v5229_v21  ;;  %p4241_p4 = pneg %p4240_p2 }
 0xa00   : > { %3776 = vmatpush3.bf16.msra.mxu1 %v5111_v54  ;;  %3872 = vmatpush3.bf16.msra.mxu0 %v5111_v54  ;;  %v2402_v18 = vsub.f32 %v5157_v5, %v2401_v47  ;;  %v2264_v41 = vadd.s32 16, %v5103_v33  ;;  %v5266_v19 = vpack.c.bf16 %v2364_v17, %v2361_v23  ;;  %v2444_v34 = vand.u32 4294901760, %v2443_v24 }
 0xa01   : > { %3778 = vmatprep.subr.bf16.mxu1 %v5139_v3  ;;  %3874 = vmatprep.subr.bf16.mxu0 %v5139_v3  ;;  %v2457_v56 = vsub.f32 %v5202_v43, %v2456_v25  ;;  %v5272_v49 = vsub.f32 %v5095_v50, %v2340_v57  ;;  %v2451_v42 = vand.u32 4294901760, %v2450_v26  ;;  %v2464_v55 = vsub.f32 %v5222_v1, %v2463_v27  ;;  %p4248_p8 = pnand %p4247_p7, %p4241_p4 }
 0xa02   : > { %3683 = vmatprep.mubr.f32.mxu0 %v2401_v47  ;;  %v2403_v38 = vand.u32 4294901760, %v2402_v18  ;;  %v2477_v59 = vand.u32 4294901760, %v5250_v28  ;;  %v2265_v60 = vadd.s32 24, %v5103_v33  ;;  %v2484_v61 = vand.u32 4294901760, %v5255_v32 }
 0xa03   : > { %v5283_v2 = vsub.f32 %v5120_v22, %v2343_v7  ;;  %v5288_v50 = vsub.f32 %v5123_v37, %v2346_v51  ;;  %v2270_v57 = vadd.s32 %v5099_v53, %v2264_v41  ;;  %v3893_v47 = vpack.c.bf16 %v2449_v39, %v2442_v29 }
 0xa04   : > { %3780 = vmatpush3.bf16.msra.mxu1 %v5139_v3  ;;  %3876 = vmatpush3.bf16.msra.mxu0 %v5139_v3  ;;  %v2412_v18 = vsub.f32 %v5224_v11, %v2411_v36  ;;  %v5292_v12 = vpack.c.bf16 %v2463_v27, %v2456_v25  ;;  %v2471_v33 = vsub.f32 %v5229_v21, %v2470_v63  ;;  %v2458_v22 = vand.u32 4294901760, %v2457_v56 }
 0xa05   : > { %3782 = vmatprep.subr.bf16.mxu1 %v5174_v15  ;;  %3878 = vmatprep.subr.bf16.mxu0 %v5174_v15  ;;  %v2491_v7 = vand.u32 4294901760, %v5272_v49  ;;  %vm2279_vm9 = vcmp.ge.s32.totalorder %v2270_v57, %v5115_v58  ;;  %vm2288_vm10 = vcmp.lt.s32.totalorder %v2270_v57, %v5117_v8  ;;  %v3797_v37 = vpack.c.bf16 %v2451_v42, %v2444_v34 }
 0xa06   : > { %3569 = vmatprep.mubr.f32.mxu1 %v2403_v38  ;;  %v2465_v51 = vand.u32 4294901760, %v2464_v55  ;;  %v2478_v29 = vsub.f32 %v5250_v28, %v2477_v59  ;;  %vm5303_vm11 = vmand %vm2279_vm9, %vm2288_vm10  ;;  %v2271_v39 = vadd.s32 %v5099_v53, %v2265_v60  ;;  %v2485_v24 = vsub.f32 %v5255_v32, %v2484_v61 }
 0xa07   : > { %v2498_v25 = vand.u32 4294901760, %v5283_v2  ;;  %v2505_v26 = vand.u32 4294901760, %v5288_v50  ;;  %v3307_v27 = vsel %vm5303_vm11, 1.0, %v4376_v46  ;;  %v2413_v41 = vand.u32 4294901760, %v2412_v18 }
 0xa08   : > { %3784 = vmatpush3.bf16.msra.mxu1 %v5174_v15  ;;  %3880 = vmatpush3.bf16.msra.mxu0 %v5174_v15  ;;  %v5319_v34 = vsub.f32 %v5144_v44, %v2349_v13  ;;  %v5324_v53 = vsub.f32 %v5151_v10, %v2352_v31  ;;  %v5326_v56 = vsub.f32 %v3307_v27, %v3307_v27  ;;  %v2472_v13 = vand.u32 4294901760, %v2471_v33 }
 0xa09   : > { %3786 = vmatprep.subr.bf16.mxu1 %v5210_v30  ;;  %3882 = vmatprep.subr.bf16.mxu0 %v5210_v30  ;;  %v2492_v42 = vsub.f32 %v5272_v49, %v2491_v7  ;;  %vm2280_vm12 = vcmp.ge.s32.totalorder %v2271_v39, %v5115_v58  ;;  %vm2289_vm13 = vcmp.lt.s32.totalorder %v2271_v39, %v5117_v8  ;;  %v2479_v55 = vand.u32 4294901760, %v2478_v29 }
 0xa0a   : > { %v3801_v44 = vpack.c.bf16 %v2465_v51, %v2458_v22  ;;  %v2421_v10 = vand.u32 4294901760, %v5326_v56  ;;  %vm5334_vm14 = vmand %vm2280_vm12, %vm2289_vm13  ;;  %v3901_v60 = vpack.c.bf16 %v2477_v59, %v2470_v63  ;;  %v2499_v57 = vsub.f32 %v5283_v2, %v2498_v25 }
 0xa0b   : > { %v3308_v58 = vsel %vm5334_vm14, 1.0, %v4376_v46  ;;  %v2486_v8 = vand.u32 4294901760, %v2485_v24  ;;  %v2506_v18 = vsub.f32 %v5288_v50, %v2505_v26  ;;  %v2493_v63 = vand.u32 4294901760, %v2492_v42 }
 0xa0c   : > { %3788 = vmatpush3.bf16.msra.mxu1 %v5210_v30  ;;  %3884 = vmatpush3.bf16.msra.mxu0 %v5210_v30  ;;  %v2422_v33 = vsub.f32 %v5326_v56, %v2421_v10  ;;  %v5348_v22 = vsub.f32 %v3308_v58, %v3308_v58  ;;  %v2512_v59 = vand.u32 4294901760, %v5319_v34  ;;  %v2519_v51 = vand.u32 4294901760, %v5324_v53 }
 0xa0d   : > { %3790 = vmatprep.subr.bf16.mxu1 %v5243_v35  ;;  %3886 = vmatprep.subr.bf16.mxu0 %v5243_v35  ;;  %v5355_v46 = vsub.f32 %v5164_v14, %v2355_v9  ;;  %v5361_v29 = vsub.f32 %v5178_v62, %v2358_v20  ;;  %v3905_v39 = vpack.c.bf16 %v2491_v7, %v2484_v61  ;;  %v2500_v24 = vand.u32 4294901760, %v2499_v57 }
 0xa0e   : > { %v2507_v27 = vand.u32 4294901760, %v2506_v18  ;;  %v3809_v9 = vpack.c.bf16 %v2493_v63, %v2486_v8  ;;  %v2513_v62 = vsub.f32 %v5319_v34, %v2512_v59  ;;  %v2520_v20 = vsub.f32 %v5324_v53, %v2519_v51 }
 0xa0f   : > { %v2533_v61 = vand.u32 4294901760, %v5361_v29  ;;  %v5375_v7 = vsub.f32 %v5213_v48, %v2361_v23  ;;  %v3909_v48 = vpack.c.bf16 %v2505_v26, %v2498_v25  ;;  %v3913_v25 = vpack.c.bf16 %v2519_v51, %v2512_v59 }
 0xa10   : > { %3792 = vmatpush3.bf16.msra.mxu1 %v5243_v35  ;;  %3888 = vmatpush3.bf16.msra.mxu0 %v5243_v35  ;;  %v2514_v23 = vand.u32 4294901760, %v2513_v62 }
 0xa11   : > { %3794 = vmatprep.subr.bf16.mxu1 %v5266_v19  ;;  %3890 = vmatprep.subr.bf16.mxu0 %v5266_v19 }
 0xa14   : > { %3796 = vmatpush3.bf16.msra.mxu1 %v5266_v19  ;;  %3892 = vmatpush3.bf16.msra.mxu0 %v5266_v19 }
 0xa15   : > { %3798 = vmatprep.subr.bf16.mxu1 %v3797_v37  ;;  %3894 = vmatprep.subr.bf16.mxu0 %v3893_v47 }
 0xa17   : > { %3570 = vmatmul.mubr.f32.vlgmr.msra.gmra.mrb[0].mxu1 %v2413_v41  ;;  %3684 = vmatmul.mubr.f32.vlgmr.msra.gmra.mrb[0].mxu0 %v2411_v36  ;;  %v3805_v36 = vpack.c.bf16 %v2479_v55, %v2472_v13  ;;  %v2526_v41 = vand.u32 4294901760, %v5355_v46  ;;  %v3813_v13 = vpack.c.bf16 %v2507_v27, %v2500_v24  ;;  %v2521_v55 = vand.u32 4294901760, %v2520_v20 }
 0xa18   : > { %3800 = vmatpush3.bf16.msra.mxu1 %v3797_v37  ;;  %3896 = vmatpush3.bf16.msra.mxu0 %v3893_v47  ;;  %v2423_v47 = vand.u32 4294901760, %v2422_v33  ;;  %v2431_v37 = vand.u32 4294901760, %v5348_v22 }
 0xa19   : > { %3802 = vmatprep.subr.bf16.mxu1 %v3801_v44  ;;  %3898 = vmatprep.subr.bf16.mxu0 %v5292_v12  ;;  %v3917_v63 = vpack.c.bf16 %v2533_v61, %v2526_v41 }
 0xa1a   : > { %3686 = vmatprep.mubr.f32.mxu0 %v2421_v10  ;;  %3572 = vmatprep.mubr.f32.mxu1 %v2423_v47  ;;  %v2432_v14 = vsub.f32 %v5348_v22, %v2431_v37  ;;  %v2540_v10 = vand.u32 4294901760, %v5375_v7 }
 0xa1b   : > { %3687 = vmatmul.mubr.f32.gmra.mrb[2].mxu0 %v2431_v37  ;;  %v3829_v37 = vpack.c.bf16 %v5182_v16, %v5166_v6  ;;  %v3837_v6 = vpack.c.bf16 %v5250_v28, %v5229_v21 }
 0xa1c   : > { %3804 = vmatpush3.bf16.msra.mxu1 %v3801_v44  ;;  %3900 = vmatpush3.bf16.msra.mxu0 %v5292_v12  ;;  %v5380_v12 = vsub.f32 %v5216_v40, %v2364_v17  ;;  %v2433_v42 = vand.u32 4294901760, %v2432_v14  ;;  %v4377_v44 = vmov 1.0   ;;  %v2527_v40 = vsub.f32 %v5355_v46, %v2526_v41 }
 0xa1d   : > { %3806 = vmatprep.subr.bf16.mxu1 %v3805_v36  ;;  %3902 = vmatprep.subr.bf16.mxu0 %v3901_v60  ;;  %v2534_v17 = vsub.f32 %v5361_v29, %v2533_v61  ;;  %v2541_v8 = vsub.f32 %v5375_v7, %v2540_v10 }
 0xa1e   : > { %3721 = vmatprep.mubr.msk.f32.mxu0 %vm5146_vm5, %v4377_v44  ;;  %3573 = vmatmul.mubr.f32.gmra.mrb[2].mxu1 %v2433_v42  ;;  %v2547_v57 = vand.u32 4294901760, %v5380_v12  ;;  %v2528_v26 = vand.u32 4294901760, %v2527_v40 }
 0xa1f   : > { %3607 = vmatprep.mubr.msk.f32.mxu1 %vm5146_vm5, %v4377_v44  ;;  %v2535_v58 = vand.u32 4294901760, %v2534_v17 }
 0xa20   : > { %3808 = vmatpush3.bf16.msra.mxu1 %v3805_v36  ;;  %3904 = vmatpush3.bf16.msra.mxu0 %v3901_v60  ;;  %v3817_v60 = vpack.c.bf16 %v2521_v55, %v2514_v23  ;;  %v2548_v18 = vsub.f32 %v5380_v12, %v2547_v57  ;;  %v2542_v36 = vand.u32 4294901760, %v2541_v8  ;;  %v3921_v51 = vpack.c.bf16 %v2547_v57, %v2540_v10 }
 0xa21   : > { %3810 = vmatprep.subr.bf16.mxu1 %v3809_v9  ;;  %3906 = vmatprep.subr.bf16.mxu0 %v3905_v39  ;;  %v3821_v33 = vpack.c.bf16 %v2535_v58, %v2528_v26 }
 0xa22   : > { %v2549_v47 = vand.u32 4294901760, %v2548_v18 }
 0xa24   : > { %3812 = vmatpush3.bf16.msra.mxu1 %v3809_v9  ;;  %3908 = vmatpush3.bf16.msra.mxu0 %v3905_v39  ;;  %v3825_v59 = vpack.c.bf16 %v2549_v47, %v2542_v36  ;;  %v3833_v39 = vpack.c.bf16 %v5222_v1, %v5202_v43 }
 0xa25   : > { %3814 = vmatprep.subr.bf16.mxu1 %v3813_v13  ;;  %3910 = vmatprep.subr.bf16.mxu0 %v3909_v48 }
 0xa28   : > { %3816 = vmatpush3.bf16.msra.mxu1 %v3813_v13  ;;  %3912 = vmatpush3.bf16.msra.mxu0 %v3909_v48 }
 0xa29   : > { %3818 = vmatprep.subr.bf16.mxu1 %v3817_v60  ;;  %3914 = vmatprep.subr.bf16.mxu0 %v3913_v25 }
 0xa2c   : > { %3820 = vmatpush3.bf16.msra.mxu1 %v3817_v60  ;;  %3916 = vmatpush3.bf16.msra.mxu0 %v3913_v25 }
 0xa2d   : > { %3822 = vmatprep.subr.bf16.mxu1 %v3821_v33  ;;  %3918 = vmatprep.subr.bf16.mxu0 %v3917_v63 }
 0xa30   : > { %3824 = vmatpush3.bf16.msra.mxu1 %v3821_v33  ;;  %3920 = vmatpush3.bf16.msra.mxu0 %v3917_v63 }
 0xa31   : > { %3826 = vmatprep.subr.bf16.mxu1 %v3825_v59  ;;  %3922 = vmatprep.subr.bf16.mxu0 %v3921_v51 }
 0xa34   : > { %3828 = vmatpush3.bf16.msra.mxu1 %v3825_v59  ;;  %3924 = vmatpush3.bf16.msra.mxu0 %v3921_v51 }
 0xa35   : > { %3830 = vmatprep.subr.bf16.mxu1 %v3829_v37  ;;  %3926 = vmatprep.subr.bf16.mxu0 %v5081_v52 }
 0xa37   : > { %3608 = vmatmul.mubr.msk.f32.vlgmr.msra.gmra.mrb[0].mxu1 %vm5186_vm8, %v4377_v44  ;;  %3722 = vmatmul.mubr.msk.f32.vlgmr.msra.gmra.mrb[0].mxu0 %vm5186_vm8, %v4377_v44 }
 0xa38   : > { %3832 = vmatpush3.bf16.msra.mxu1 %v3829_v37  ;;  %3928 = vmatpush3.bf16.msra.mxu0 %v5081_v52  ;;  %v3841_v52 = vpack.c.bf16 %v5272_v49, %v5255_v32 }
 0xa39   : > { %3834 = vmatprep.subr.bf16.mxu1 %v3833_v39  ;;  %3930 = vmatprep.subr.bf16.mxu0 %v5089_v4 }
 0xa3a   : > { %3610 = vmatprep.mubr.msk.f32.mxu1 %vm5303_vm11, %v4377_v44  ;;  %3724 = vmatprep.mubr.msk.f32.mxu0 %vm5303_vm11, %v4377_v44 }
 0xa3b   : > { %3611 = vmatmul.mubr.msk.f32.gmra.mrb[2].mxu1 %vm5334_vm14, %v4377_v44  ;;  %3725 = vmatmul.mubr.msk.f32.gmra.mrb[2].mxu0 %vm5334_vm14, %v4377_v44 }
 0xa3c   : > { %3836 = vmatpush3.bf16.msra.mxu1 %v3833_v39  ;;  %3932 = vmatpush3.bf16.msra.mxu0 %v5089_v4  ;;  %v3845_v4 = vpack.c.bf16 %v5288_v50, %v5283_v2 }
 0xa3d   : > { %3838 = vmatprep.subr.bf16.mxu1 %v3837_v6  ;;  %3934 = vmatprep.subr.bf16.mxu0 %v5111_v54 }
 0xa3e   : > { %3645 = vmatprep.mubr.f32.mxu1 %v5157_v5  ;;  %3759 = vmatprep.mubr.msk.f32.mxu0 %vm5146_vm5, %v4377_v44  ;;  %v3849_v5 = vpack.c.bf16 %v5324_v53, %v5319_v34 }
 0xa40   : > { %3840 = vmatpush3.bf16.msra.mxu1 %v3837_v6  ;;  %3936 = vmatpush3.bf16.msra.mxu0 %v5111_v54  ;;  %v3853_v54 = vpack.c.bf16 %v5361_v29, %v5355_v46 }
 0xa41   : > { %3842 = vmatprep.subr.bf16.mxu1 %v3841_v52  ;;  %3938 = vmatprep.subr.bf16.mxu0 %v5139_v3 }
 0xa44   : > { %3844 = vmatpush3.bf16.msra.mxu1 %v3841_v52  ;;  %3940 = vmatpush3.bf16.msra.mxu0 %v5139_v3  ;;  %v3857_v3 = vpack.c.bf16 %v5380_v12, %v5375_v7 }
 0xa45   : > { %3846 = vmatprep.subr.bf16.mxu1 %v3845_v4  ;;  %3942 = vmatprep.subr.bf16.mxu0 %v5174_v15 }
 0xa48   : > { %3848 = vmatpush3.bf16.msra.mxu1 %v3845_v4  ;;  %3944 = vmatpush3.bf16.msra.mxu0 %v5174_v15 }
 0xa49   : > { %3850 = vmatprep.subr.bf16.mxu1 %v3849_v5  ;;  %3946 = vmatprep.subr.bf16.mxu0 %v5210_v30 }
 0xa4c   : > { %3852 = vmatpush3.bf16.msra.mxu1 %v3849_v5  ;;  %3948 = vmatpush3.bf16.msra.mxu0 %v5210_v30 }
 0xa4d   : > { %3854 = vmatprep.subr.bf16.mxu1 %v3853_v54  ;;  %3950 = vmatprep.subr.bf16.mxu0 %v5243_v35 }
 0xa50   : > { %3856 = vmatpush3.bf16.msra.mxu1 %v3853_v54  ;;  %3952 = vmatpush3.bf16.msra.mxu0 %v5243_v35 }
 0xa51   : > { %3858 = vmatprep.subr.bf16.mxu1 %v3857_v3  ;;  %3954 = vmatprep.subr.bf16.mxu0 %v5266_v19 }
 0xa54   : > { %3860 = vmatpush3.bf16.msra.mxu1 %v3857_v3  ;;  %3956 = vmatpush3.bf16.msra.mxu0 %v5266_v19 }
 0xa57   : > { %3646 = vmatmul.mubr.f32.vlgmr.msra.gmra.mrb[0].mxu1 %v5224_v11  ;;  %3760 = vmatmul.mubr.msk.f32.vlgmr.msra.gmra.mrb[0].mxu0 %vm5186_vm8, %v4377_v44 }
 0xa58   : > { %3648 = vmatprep.mubr.f32.mxu1 %v5326_v56  ;;  %3762 = vmatprep.mubr.msk.f32.mxu0 %vm5303_vm11, %v4377_v44 }
 0xa5b   : > { %3649 = vmatmul.mubr.f32.gmra.mrb[2].mxu1 %v5348_v22  ;;  %3763 = vmatmul.mubr.msk.f32.gmra.mrb[2].mxu0 %vm5334_vm14, %v4377_v44 }
 0xa5c   : > { %4251 = shalt.err (!%p4248_p8)
}
 0xa5d   : > { %s4252_s16 = scalar_lea.hbm %s5472_s18, 16  ;;  %s4256_s23 = scalar_lea.hbm %s5563_s12, 32 }
 0xa5e   : > { %p4253_p10 = scmp.ne.s32.totalorder %s5472_s18, %s4252_s16  ;;  %p4257_p13 = scmp.lt.u32.totalorder %s5472_s18, %s5563_s12 }
 0xa5f   : > { %p4258_p0 = scmp.lt.u32.totalorder %s4256_s23, %s4252_s16  ;;  %p4260_p2 = scmp.lt.u32.totalorder %s4252_s16, %s5472_s18 }
 0xa60   : > { %p4254_p11 = pnand %p4253_p10, %p4502_p3 }
 0xa61   : > { %p4259_p1 = por %p4258_p0, %p4257_p13 }
 0xa62   : > { %p4255_p12 = pneg %p4254_p11 }
 0xa63   : > { %p4261_p4 = por %p4260_p2, %p4259_p1 }
 0xa65   : > { %p4262_p5 = pnand %p4261_p4, %p4255_p12 }
 0xa67   : > { %4265 = shalt.err (!%p4262_p5)
}
 0xa68   : > { %3983 = dma.vmem_to_hbm [thread:$0]  (%p4502_p3), %s3124_s19, 16, %s5472_s18, %s3103_s27  }
 0xa69   : > { %s5497_s29 = scalar_lea.hbm %s5564_s13, %s3321_s30  ;;  %s5597_s15 = scalar_lea.vmem [#allocation7], %s4523_s26 }
 0xa6a   : > { %s3136_s20 = sshll.u32 %s5597_s15, 4  ;;  %s3107_s16 = scalar_lea.sflag [#allocation8], %s4523_s26  ;;  %s3137_s20 = int_to_ptr.vmem [resolvable:$true] %s3136_s20 }
 0xa6b   : > { %s4266_s25 = scalar_lea.vmem %s3137_s20, 16  ;;  %s4379_s23 = smov [#allocation7]  }
 0xa6c   : > { %p4267_p6 = scmp.ne.s32.totalorder %s3137_s20, %s4266_s25  ;;  %s4270_s22 = sshll.u32 %s4379_s23, 4  ;;  %s4271_s22 = int_to_ptr.vmem [resolvable:$false] %s4270_s22 }
 0xa6d   : > { %s4272_s17 = scalar_lea.vmem %s4271_s22, 32  ;;  %p4273_p10 = scmp.lt.s32.totalorder %s3137_s20, %s4271_s22 }
 0xa6e   : > { %p4268_p7 = pnand %p4267_p6, %p4502_p3  ;;  %p4274_p11 = scmp.lt.s32.totalorder %s4272_s17, %s4266_s25 }
 0xa70   : > { %p4269_p8 = pneg %p4268_p7  ;;  %p4275_p12 = por %p4274_p11, %p4273_p10 }
 0xa72   : > { %p4276_p13 = pnand %p4275_p12, %p4269_p8 }
 0xa74   : > { %4279 = shalt.err (!%p4276_p13)
}
 0xa75   : > { %s4280_s14 = scalar_lea.hbm %s5497_s29, 16  ;;  %s4284_s19 = scalar_lea.hbm %s5564_s13, 32 }
 0xa76   : > { %p4281_p0 = scmp.ne.s32.totalorder %s5497_s29, %s4280_s14  ;;  %p4285_p4 = scmp.lt.u32.totalorder %s5497_s29, %s5564_s13 }
 0xa77   : > { %p4286_p5 = scmp.lt.u32.totalorder %s4284_s19, %s4280_s14  ;;  %p4288_p7 = scmp.lt.u32.totalorder %s4280_s14, %s5497_s29 }
 0xa78   : > { %p4282_p1 = pnand %p4281_p0, %p4502_p3 }
 0xa79   : > { %p4287_p6 = por %p4286_p5, %p4285_p4 }
 0xa7a   : > { %p4283_p2 = pneg %p4282_p1 }
 0xa7b   : > { %p4289_p8 = por %p4288_p7, %p4287_p6 }
 0xa7d   : > { %p4290_p10 = pnand %p4289_p8, %p4283_p2 }
 0xa7f   : > { %4293 = shalt.err (!%p4290_p10)
}
 0xa80   : > { %3984 = dma.vmem_to_hbm [thread:$0]  (%p4502_p3), %s3137_s20, 16, %s5497_s29, %s3107_s16   ;;  %vm3088_vm15 = vcmask 261120  }
 0xb2a   : > { %v3647_v45 = vpop.f32.mrb[0].mxu1  ;;  %v3761_v15 = vpop.f32.mrb[0].mxu0 }
 0xb2b   : > { %v3957_v16 = vadd.f32 %v3761_v15, %v3647_v45  ;;  %v2708_v0 = vpop.f32.mrb[1].mxu1  ;;  %v3066_v43 = vpop.f32.mrb[1].mxu0 }
 0xb2c   : > { %v3958_v30 = vadd.f32 %v3066_v43, %v2708_v0 }
 0xb2d   : > { %3090 = vst.msk [vmem:[%s4536_s28 + $0x8] sm:$0xff] %vm3088_vm15, %v3957_v16 }
 0xb2e   : > { %3089 = vst.msk [vmem:[%s4536_s28] sm:$0xff] %vm3088_vm15, %v3958_v30  ;;  %v3650_v1 = vpop.f32.mrb[2].mxu1  ;;  %v3764_v11 = vpop.f32.mrb[2].mxu0 }
 0xb2f   : > { %v3959_v21 = vadd.f32 %v3764_v11, %v3650_v1  ;;  %v2722_v35 = vpop.f32.mrb[3].mxu1  ;;  %v3078_v28 = vpop.f32.mrb[3].mxu0 }
 0xb30   : > { %v3960_v32 = vadd.f32 %v3078_v28, %v2722_v35 }
 0xb31   : > { %3092 = vst.msk [vmem:[%s4536_s28 + $0x18] sm:$0xff] %vm3088_vm15, %v3959_v21 }
 0xb32   : > { %3091 = vst.msk [vmem:[%s4536_s28 + $0x10] sm:$0xff] %vm3088_vm15, %v3960_v32 }
 0xb33 PF: > { %s5598_s21 = sld [smem:[#allocation16_spill]]  ;;  %s5599_s10 = sld [smem:[#allocation11_spill]] }
 0xb39   : > { %p3994_p3 = scmp.ge.s32.totalorder %s5598_s21, 2  ;;  %s3160_s29 = sand.u32 1, %s5599_s10  }
 0xb3a   : > { %s3161_s15 = scalar_lea.sflag [#allocation6], %s3160_s29 }
 0xb3b   : > { %p3988_p11 = pnand %p3994_p3, %p4512_p9 }
 0xb3d   : > { %4327 = dma.done.wait (!%p3988_p11), %s3161_s15, 16  }
 0xb3e   : > { %4329 = vsyncadd (!%p3988_p11), %s3161_s15, 4294967280  ;;  %s3169_s20 = scalar_lea.sflag [#allocation8], %s3160_s29 }
 0xb3f   : > { %4331 = dma.done.wait (!%p3988_p11), %s3169_s20, 16  }
 0xb40   : > { %4333 = vsyncadd (!%p3988_p11), %s3169_s20, 4294967280  ;;  %s32_s10 = sadd.s32 1, %s5598_s21   ;;  %s5601_s27 = sld [smem:[#allocation12_spill]] }
 0xb41   : > { %p29_p12 = scmp.ge.s32.totalorder %s32_s10, 6   ;;  %s5602_s28 = sld [smem:[#allocation13_spill]] }
 0xb42   : > { %s5603_s29 = sld [smem:[#allocation20_spill]]  ;;  %s5604_s30 = sld [smem:[#allocation14_spill]] }
 0xb43   : > { %s5605_s14 = sld [smem:[#allocation15_spill]]  ;;  %s5606_s15 = sld [smem:[#allocation17_spill]] }
 0xb44   : > { %s5607_s16 = sld [smem:[#allocation18_spill]]  ;;  %31 = sbr.rel (!%p29_p12) target bundleno = 10 (0xa), region = 132 }
 0xb4b   :  { %3173 = vsyncpa [#allocation6], 1 }
 0xb4c   :  { %3175 = vsyncpa [#allocation6 + $0x1], 1 }
 0xb4d   :  { %3176 = vsyncpa [#allocation8], 1 }
 0xb4e   :  { %3178 = vsyncpa [#allocation8 + $0x1], 1 }

</bundles_post_ra>
